<compile_context>
chip_gen: v7x
topology: tpu7x:2x2x1
jax: 0.10.0
libtpu: 0.0.40
codegen_flags: <defaults>
</compile_context>

<pallas_src>
import jax
import jax.numpy as jnp
from jax.experimental import pallas as pl
from jax.experimental.pallas import tpu as pltpu


# ---------------------------------------------------------------------------
# Fused Pallas kernel
# ---------------------------------------------------------------------------
def make_fused_kernel(B, T, H):
    H2 = 2 * H
    G8 = 8 * H

    def kernel(x_ref, wf_ref, bf_ref, wih_ref, bcat_ref, whh_ref, o_ref):
        f32 = jnp.float32

        # 1) TimeDistributed input_block (Flatten -> Linear -> ReLU) on all
        #    T*B frames as one MXU matmul.  Rows are time-major (t*B + b).
        feats = jnp.maximum(
            jnp.dot(x_ref[...], wf_ref[...], preferred_element_type=f32)
            + bf_ref[...],
            0.0,
        )  # (T*B, F)

        # 2) ONE fused input projection for both directions and all 4 gates
        #    (column layout [i_f i_b | f_f f_b | g_f g_b | o_f o_b]), reshaped
        #    time-major so per-step reads are contiguous leading-axis slices.
        gin = (jnp.dot(feats, wih_ref[...], preferred_element_type=f32)
               + bcat_ref[...]).reshape(T, B, G8)          # (T, B, 8H)

        whh = whh_ref[...]                                  # (2H, 8H) block-diag

        # Lane masks, built once and reused every unrolled step.
        col8 = jax.lax.broadcasted_iota(jnp.int32, (B, G8), 1)
        is_bwd8 = (col8 % H2) >= H          # bwd lanes inside each 2H gate group
        col2 = jax.lax.broadcasted_iota(jnp.int32, (B, H2), 1)
        is_fwd2 = col2 < H                  # fwd half of a (B, 2H) state

        h_cat = jnp.zeros((B, H2), f32)     # [h_f | h_b]
        c_cat = jnp.zeros((B, H2), f32)     # [c_f | c_b]
        hs = []

        # 3) Recurrence: fully unrolled (T small & static).  Forward lanes read
        #    time s, backward lanes read time T-1-s; one MXU matmul per step.
        for s in range(T):
            g_pre = jnp.where(is_bwd8, gin[T - 1 - s], gin[s])            # (B, 8H)
            g = g_pre + jnp.dot(h_cat, whh, preferred_element_type=f32)   # (B, 8H)
            i_g = jax.nn.sigmoid(g[:, 0 * H2:1 * H2])
            f_g = jax.nn.sigmoid(g[:, 1 * H2:2 * H2])
            g_g = jnp.tanh(g[:, 2 * H2:3 * H2])
            o_g = jax.nn.sigmoid(g[:, 3 * H2:4 * H2])
            c_cat = f_g * c_cat + i_g * g_g
            h_cat = o_g * jnp.tanh(c_cat)
            hs.append(h_cat)                # fwd half = time s, bwd half = T-1-s

        # 4) Assemble (B, T, 2H) and store once (no per-step masked stores).
        #    Output time t: fwd half from step t, bwd half from step T-1-t.
        rows = [jnp.where(is_fwd2, hs[t], hs[T - 1 - t]) for t in range(T)]
        o_ref[...] = jnp.stack(rows, axis=1)                # (B, T, 2H)

    return kernel


# ---------------------------------------------------------------------------
# Wrapper
# ---------------------------------------------------------------------------
def lstm_block_forward(x, params):
    """x: (B, T, C, H, W) float32 -> (B, T, 2 * n_lstm_units) float32."""
    B, T, C, Hs, Ws = x.shape
    D = C * Hs * Ws
    H = params["whh_f"].shape[0]

    # Time-major frame layout (row = t*B + b); the input_block is per-frame so
    # the order is free, and it makes the gate tensor (T, B, 8H) in-kernel.
    x_tm = jnp.swapaxes(x, 0, 1).reshape(T * B, D)

    # Gate-major, direction-interleaved column layout:
    #   [i_f i_b | f_f f_b | g_f g_b | o_f o_b]   (each block H wide)
    def gates(w):
        return [w[:, k * H:(k + 1) * H] for k in range(4)]

    gf, gb = gates(params["wih_f"]), gates(params["wih_b"])
    wih_cat = jnp.concatenate(
        [blk for k in range(4) for blk in (gf[k], gb[k])], axis=1)     # (F, 8H)
    bf, bb = gates(params["b_f"]), gates(params["b_b"])
    b_cat = jnp.concatenate(
        [blk for k in range(4) for blk in (bf[k], bb[k])], axis=1)     # (1, 8H)

    # Block-diagonal recurrent weights -> ONE (B,2H)x(2H,8H) matmul per step.
    hf, hb = gates(params["whh_f"]), gates(params["whh_b"])
    z = jnp.zeros((H, H), jnp.float32)
    whh_bd = jnp.concatenate(
        [blk for k in range(4)
         for blk in (jnp.concatenate([hf[k], z], axis=0),
                     jnp.concatenate([z, hb[k]], axis=0))], axis=1)    # (2H, 8H)

    kernel = make_fused_kernel(B, T, H)
    return pl.pallas_call(
        kernel,
        out_shape=jax.ShapeDtypeStruct((B, T, 2 * H), jnp.float32),
        compiler_params=pltpu.CompilerParams(
            vmem_limit_bytes=32 * 1024 * 1024,
        ),
    )(x_tm, params["w_feat"], params["b_feat"], wih_cat, b_cat, whh_bd)


# ---------------------------------------------------------------------------
# Pure-JAX reference (for a sanity check against the kernel)
# ---------------------------------------------------------------------------
def reference_forward(x, params):
    B, T, C, Hs, Ws = x.shape
    H = params["whh_f"].shape[0]
    hp = jax.lax.Precision.HIGHEST
    xf = x.reshape(B * T, -1)
    feats = jnp.maximum(
        jnp.dot(xf, params["w_feat"], precision=hp) + params["b_feat"], 0.0)
    feats = feats.reshape(B, T, -1)

    def run(w_ih, w_hh, b, reverse):
        seq = feats[:, ::-1, :] if reverse else feats
        seq_t = jnp.swapaxes(seq, 0, 1)  # (T, B, F)

        def step(carry, x_t):
            h, c = carry
            g = (jnp.dot(x_t, w_ih, precision=hp)
                 + jnp.dot(h, w_hh, precision=hp) + b)
            i_g = jax.nn.sigmoid(g[:, 0 * H:1 * H])
            f_g = jax.nn.sigmoid(g[:, 1 * H:2 * H])
            g_g = jnp.tanh(g[:, 2 * H:3 * H])
            o_g = jax.nn.sigmoid(g[:, 3 * H:4 * H])
            c = f_g * c + i_g * g_g
            h = o_g * jnp.tanh(c)
            return (h, c), h

        zero = jnp.zeros((B, H), jnp.float32)
        _, hs = jax.lax.scan(step, (zero, zero), seq_t)
        hs = jnp.swapaxes(hs, 0, 1)  # (B, T, H)
        return hs[:, ::-1, :] if reverse else hs

    out_f = run(params["wih_f"], params["whh_f"], params["b_f"], False)
    out_b = run(params["wih_b"], params["whh_b"], params["b_b"], True)
    return jnp.concatenate([out_f, out_b], axis=-1)


# ---------------------------------------------------------------------------
# Deterministic parameter construction
# ---------------------------------------------------------------------------
def make_params(key, in_dim, feature_dim, n_lstm_units):
    ks = jax.random.split(key, 8)
    H = n_lstm_units
    scale_feat = 1.0 / jnp.sqrt(in_dim)
    scale_lstm = 1.0 / jnp.sqrt(H)
    return {
        # input_block: Linear(C*H*W -> feature_dim) + ReLU
        "w_feat": jax.random.uniform(ks[0], (in_dim, feature_dim), jnp.float32,
                                     -scale_feat, scale_feat),
        "b_feat": jax.random.uniform(ks[1], (1, feature_dim), jnp.float32,
                                     -scale_feat, scale_feat),
        # forward LSTM (gate order i, f, g, o; bias = b_ih + b_hh folded)
        "wih_f": jax.random.uniform(ks[2], (feature_dim, 4 * H), jnp.float32,
                                    -scale_lstm, scale_lstm),
        "whh_f": jax.random.uniform(ks[3], (H, 4 * H), jnp.float32,
                                    -scale_lstm, scale_lstm),
        "b_f": jax.random.uniform(ks[4], (1, 4 * H), jnp.float32,
                                  -scale_lstm, scale_lstm),
        # backward LSTM
        "wih_b": jax.random.uniform(ks[5], (feature_dim, 4 * H), jnp.float32,
                                    -scale_lstm, scale_lstm),
        "whh_b": jax.random.uniform(ks[6], (H, 4 * H), jnp.float32,
                                    -scale_lstm, scale_lstm),
        "b_b": jax.random.uniform(ks[7], (1, 4 * H), jnp.float32,
                                  -scale_lstm, scale_lstm),
    }


# ---------------------------------------------------------------------------
if __name__ == "__main__":
    # x: (batch, n_of_frames, C, H, W)
    B, T, C, Hs, Ws = 2, 8, 4, 16, 16
    feature_dim = 32       # input_feature_dim
    n_lstm_units = 18      # PyTorchLstmBlock default

    key = jax.random.PRNGKey(0)
    k_x, k_p = jax.random.split(key)
    x = jax.random.normal(k_x, (B, T, C, Hs, Ws), dtype=jnp.float32)
    params = make_params(k_p, C * Hs * Ws, feature_dim, n_lstm_units)

    out = jax.jit(lstm_block_forward)(x, params)
    out = jax.block_until_ready(out)

    assert out.shape == (B, T, 2 * n_lstm_units), out.shape
    assert out.dtype == jnp.float32

    ref = jax.block_until_ready(jax.jit(reference_forward)(x, params))
    # Tolerance tightened from 2e-2 -> 5e-3 (all-f32 path); margin kept for
    # possible differences in the MXU's f32 multi-pass decomposition vs XLA's
    # HIGHEST-precision reference dot.
    assert jnp.allclose(out, ref, atol=5e-3, rtol=5e-3), (
        float(jnp.max(jnp.abs(out - ref))))

    print("KERNEL_OK")
</pallas_src>

<mosaic_0001>
module attributes {stable_mosaic.version = 11 : i64} {
  func.func @kernel(%arg0: memref<16x1024xf32, #tpu.memory_space<vmem>>, %arg1: memref<1024x32xf32, #tpu.memory_space<vmem>>, %arg2: memref<1x32xf32, #tpu.memory_space<vmem>>, %arg3: memref<32x144xf32, #tpu.memory_space<vmem>>, %arg4: memref<1x144xf32, #tpu.memory_space<vmem>>, %arg5: memref<36x144xf32, #tpu.memory_space<vmem>>, %arg6: memref<2x8x36xf32, #tpu.memory_space<vmem>>) attributes {dimension_semantics = [], scalar_prefetch = 0 : i64, scratch_operands = 0 : i64, tpu.core_type = #tpu.core_type<tc>} {
    %c0 = arith.constant 0 : index
    %c0_0 = arith.constant 0 : index
    %0 = vector.load %arg0[%c0, %c0_0] : memref<16x1024xf32, #tpu.memory_space<vmem>>, vector<16x1024xf32>
    %c0_1 = arith.constant 0 : index
    %c0_2 = arith.constant 0 : index
    %1 = vector.load %arg1[%c0_1, %c0_2] : memref<1024x32xf32, #tpu.memory_space<vmem>>, vector<1024x32xf32>
    %cst = arith.constant dense<0.000000e+00> : vector<16x32xf32>
    %2 = tpu.matmul %0, %1, %cst {dimension_numbers = #tpu.dot_dimension_numbers<[1], [0], [0], [1], [0, 0, 1, 1], [], []>} : vector<16x1024xf32>, vector<1024x32xf32>, vector<16x32xf32> -> vector<16x32xf32>
    %c0_3 = arith.constant 0 : index
    %c0_4 = arith.constant 0 : index
    %3 = vector.load %arg2[%c0_3, %c0_4] : memref<1x32xf32, #tpu.memory_space<vmem>>, vector<1x32xf32>
    %4 = vector.broadcast %3 : vector<1x32xf32> to vector<16x32xf32>
    %5 = arith.addf %2, %4 : vector<16x32xf32>
    %cst_5 = arith.constant 0.000000e+00 : f32
    %6 = vector.broadcast %cst_5 : f32 to vector<16x32xf32>
    %7 = arith.maximumf %5, %6 : vector<16x32xf32>
    %c0_6 = arith.constant 0 : index
    %c0_7 = arith.constant 0 : index
    %8 = vector.load %arg3[%c0_6, %c0_7] : memref<32x144xf32, #tpu.memory_space<vmem>>, vector<32x144xf32>
    %cst_8 = arith.constant dense<0.000000e+00> : vector<16x144xf32>
    %9 = tpu.matmul %7, %8, %cst_8 {dimension_numbers = #tpu.dot_dimension_numbers<[1], [0], [0], [1], [0, 0, 1, 1], [], []>} : vector<16x32xf32>, vector<32x144xf32>, vector<16x144xf32> -> vector<16x144xf32>
    %c0_9 = arith.constant 0 : index
    %c0_10 = arith.constant 0 : index
    %10 = vector.load %arg4[%c0_9, %c0_10] : memref<1x144xf32, #tpu.memory_space<vmem>>, vector<1x144xf32>
    %11 = vector.broadcast %10 : vector<1x144xf32> to vector<16x144xf32>
    %12 = arith.addf %9, %11 : vector<16x144xf32>
    %13 = vector.shape_cast %12 : vector<16x144xf32> to vector<8x2x144xf32>
    %c0_11 = arith.constant 0 : index
    %c0_12 = arith.constant 0 : index
    %14 = vector.load %arg5[%c0_11, %c0_12] : memref<36x144xf32, #tpu.memory_space<vmem>>, vector<36x144xf32>
    %15 = tpu.iota {dimensions = array<i32: 1>} : vector<2x144xi32>
    %c36_i32 = arith.constant 36 : i32
    %c0_i32 = arith.constant 0 : i32
    %16 = arith.cmpi eq, %c36_i32, %c0_i32 : i32
    %c1_i32 = arith.constant 1 : i32
    %17 = arith.select %16, %c1_i32, %c36_i32 : i32
    %18 = vector.broadcast %17 : i32 to vector<2x144xi32>
    %19 = arith.remsi %15, %18 : vector<2x144xi32>
    %c0_i32_13 = arith.constant 0 : i32
    %20 = vector.broadcast %c0_i32_13 : i32 to vector<2x144xi32>
    %21 = arith.cmpi ne, %19, %20 : vector<2x144xi32>
    %c0_i32_14 = arith.constant 0 : i32
    %22 = vector.broadcast %c0_i32_14 : i32 to vector<2x144xi32>
    %23 = arith.cmpi slt, %19, %22 : vector<2x144xi32>
    %c0_i32_15 = arith.constant 0 : i32
    %24 = arith.cmpi slt, %17, %c0_i32_15 : i32
    %25 = vector.broadcast %24 : i1 to vector<2x144xi1>
    %26 = vector.broadcast %25 : vector<2x144xi1> to vector<2x144xi1>
    %27 = arith.xori %23, %26 : vector<2x144xi1>
    %28 = arith.andi %27, %21 : vector<2x144xi1>
    %29 = vector.broadcast %17 : i32 to vector<2x144xi32>
    %30 = arith.addi %19, %29 : vector<2x144xi32>
    %31 = arith.select %28, %30, %19 : vector<2x144xi1>, vector<2x144xi32>
    %c18_i32 = arith.constant 18 : i32
    %32 = vector.broadcast %c18_i32 : i32 to vector<2x144xi32>
    %33 = arith.cmpi sge, %31, %32 : vector<2x144xi32>
    %34 = tpu.iota {dimensions = array<i32: 1>} : vector<2x36xi32>
    %c18_i32_16 = arith.constant 18 : i32
    %35 = vector.broadcast %c18_i32_16 : i32 to vector<2x36xi32>
    %36 = arith.cmpi slt, %34, %35 : vector<2x36xi32>
    %cst_17 = arith.constant 0.000000e+00 : f32
    %37 = vector.broadcast %cst_17 : f32 to vector<2x36xf32>
    %cst_18 = arith.constant 0.000000e+00 : f32
    %38 = vector.broadcast %cst_18 : f32 to vector<2x36xf32>
    %39 = vector.extract_strided_slice %13 {offsets = [7, 0, 0], sizes = [1, 2, 144], strides = [1, 1, 1]} : vector<8x2x144xf32> to vector<1x2x144xf32>
    %40 = vector.shape_cast %39 : vector<1x2x144xf32> to vector<2x144xf32>
    %41 = vector.extract_strided_slice %13 {offsets = [0, 0, 0], sizes = [1, 2, 144], strides = [1, 1, 1]} : vector<8x2x144xf32> to vector<1x2x144xf32>
    %42 = vector.shape_cast %41 : vector<1x2x144xf32> to vector<2x144xf32>
    %43 = arith.select %33, %40, %42 : vector<2x144xi1>, vector<2x144xf32>
    %cst_19 = arith.constant dense<0.000000e+00> : vector<2x144xf32>
    %44 = tpu.matmul %37, %14, %cst_19 {dimension_numbers = #tpu.dot_dimension_numbers<[1], [0], [0], [1], [0, 0, 1, 1], [], []>} : vector<2x36xf32>, vector<36x144xf32>, vector<2x144xf32> -> vector<2x144xf32>
    %45 = arith.addf %43, %44 : vector<2x144xf32>
    %46 = vector.extract_strided_slice %45 {offsets = [0, 0], sizes = [2, 36], strides = [1, 1]} : vector<2x144xf32> to vector<2x36xf32>
    %47 = arith.negf %46 : vector<2x36xf32>
    %48 = math.exp %47 : vector<2x36xf32>
    %cst_20 = arith.constant 1.000000e+00 : f32
    %49 = vector.broadcast %cst_20 : f32 to vector<2x36xf32>
    %50 = arith.addf %49, %48 : vector<2x36xf32>
    %51 = arith.divf %49, %50 : vector<2x36xf32>
    %52 = vector.extract_strided_slice %45 {offsets = [0, 36], sizes = [2, 36], strides = [1, 1]} : vector<2x144xf32> to vector<2x36xf32>
    %53 = arith.negf %52 : vector<2x36xf32>
    %54 = math.exp %53 : vector<2x36xf32>
    %cst_21 = arith.constant 1.000000e+00 : f32
    %55 = vector.broadcast %cst_21 : f32 to vector<2x36xf32>
    %56 = arith.addf %55, %54 : vector<2x36xf32>
    %57 = arith.divf %55, %56 : vector<2x36xf32>
    %58 = vector.extract_strided_slice %45 {offsets = [0, 72], sizes = [2, 36], strides = [1, 1]} : vector<2x144xf32> to vector<2x36xf32>
    %59 = math.tanh %58 : vector<2x36xf32>
    %60 = vector.extract_strided_slice %45 {offsets = [0, 108], sizes = [2, 36], strides = [1, 1]} : vector<2x144xf32> to vector<2x36xf32>
    %61 = arith.negf %60 : vector<2x36xf32>
    %62 = math.exp %61 : vector<2x36xf32>
    %cst_22 = arith.constant 1.000000e+00 : f32
    %63 = vector.broadcast %cst_22 : f32 to vector<2x36xf32>
    %64 = arith.addf %63, %62 : vector<2x36xf32>
    %65 = arith.divf %63, %64 : vector<2x36xf32>
    %66 = arith.mulf %57, %38 : vector<2x36xf32>
    %67 = arith.mulf %51, %59 : vector<2x36xf32>
    %68 = arith.addf %66, %67 : vector<2x36xf32>
    %69 = math.tanh %68 : vector<2x36xf32>
    %70 = arith.mulf %65, %69 : vector<2x36xf32>
    %71 = vector.extract_strided_slice %13 {offsets = [6, 0, 0], sizes = [1, 2, 144], strides = [1, 1, 1]} : vector<8x2x144xf32> to vector<1x2x144xf32>
    %72 = vector.shape_cast %71 : vector<1x2x144xf32> to vector<2x144xf32>
    %73 = vector.extract_strided_slice %13 {offsets = [1, 0, 0], sizes = [1, 2, 144], strides = [1, 1, 1]} : vector<8x2x144xf32> to vector<1x2x144xf32>
    %74 = vector.shape_cast %73 : vector<1x2x144xf32> to vector<2x144xf32>
    %75 = arith.select %33, %72, %74 : vector<2x144xi1>, vector<2x144xf32>
    %cst_23 = arith.constant dense<0.000000e+00> : vector<2x144xf32>
    %76 = tpu.matmul %70, %14, %cst_23 {dimension_numbers = #tpu.dot_dimension_numbers<[1], [0], [0], [1], [0, 0, 1, 1], [], []>} : vector<2x36xf32>, vector<36x144xf32>, vector<2x144xf32> -> vector<2x144xf32>
    %77 = arith.addf %75, %76 : vector<2x144xf32>
    %78 = vector.extract_strided_slice %77 {offsets = [0, 0], sizes = [2, 36], strides = [1, 1]} : vector<2x144xf32> to vector<2x36xf32>
    %79 = arith.negf %78 : vector<2x36xf32>
    %80 = math.exp %79 : vector<2x36xf32>
    %cst_24 = arith.constant 1.000000e+00 : f32
    %81 = vector.broadcast %cst_24 : f32 to vector<2x36xf32>
    %82 = arith.addf %81, %80 : vector<2x36xf32>
    %83 = arith.divf %81, %82 : vector<2x36xf32>
    %84 = vector.extract_strided_slice %77 {offsets = [0, 36], sizes = [2, 36], strides = [1, 1]} : vector<2x144xf32> to vector<2x36xf32>
    %85 = arith.negf %84 : vector<2x36xf32>
    %86 = math.exp %85 : vector<2x36xf32>
    %cst_25 = arith.constant 1.000000e+00 : f32
    %87 = vector.broadcast %cst_25 : f32 to vector<2x36xf32>
    %88 = arith.addf %87, %86 : vector<2x36xf32>
    %89 = arith.divf %87, %88 : vector<2x36xf32>
    %90 = vector.extract_strided_slice %77 {offsets = [0, 72], sizes = [2, 36], strides = [1, 1]} : vector<2x144xf32> to vector<2x36xf32>
    %91 = math.tanh %90 : vector<2x36xf32>
    %92 = vector.extract_strided_slice %77 {offsets = [0, 108], sizes = [2, 36], strides = [1, 1]} : vector<2x144xf32> to vector<2x36xf32>
    %93 = arith.negf %92 : vector<2x36xf32>
    %94 = math.exp %93 : vector<2x36xf32>
    %cst_26 = arith.constant 1.000000e+00 : f32
    %95 = vector.broadcast %cst_26 : f32 to vector<2x36xf32>
    %96 = arith.addf %95, %94 : vector<2x36xf32>
    %97 = arith.divf %95, %96 : vector<2x36xf32>
    %98 = arith.mulf %89, %68 : vector<2x36xf32>
    %99 = arith.mulf %83, %91 : vector<2x36xf32>
    %100 = arith.addf %98, %99 : vector<2x36xf32>
    %101 = math.tanh %100 : vector<2x36xf32>
    %102 = arith.mulf %97, %101 : vector<2x36xf32>
    %103 = vector.extract_strided_slice %13 {offsets = [5, 0, 0], sizes = [1, 2, 144], strides = [1, 1, 1]} : vector<8x2x144xf32> to vector<1x2x144xf32>
    %104 = vector.shape_cast %103 : vector<1x2x144xf32> to vector<2x144xf32>
    %105 = vector.extract_strided_slice %13 {offsets = [2, 0, 0], sizes = [1, 2, 144], strides = [1, 1, 1]} : vector<8x2x144xf32> to vector<1x2x144xf32>
    %106 = vector.shape_cast %105 : vector<1x2x144xf32> to vector<2x144xf32>
    %107 = arith.select %33, %104, %106 : vector<2x144xi1>, vector<2x144xf32>
    %cst_27 = arith.constant dense<0.000000e+00> : vector<2x144xf32>
    %108 = tpu.matmul %102, %14, %cst_27 {dimension_numbers = #tpu.dot_dimension_numbers<[1], [0], [0], [1], [0, 0, 1, 1], [], []>} : vector<2x36xf32>, vector<36x144xf32>, vector<2x144xf32> -> vector<2x144xf32>
    %109 = arith.addf %107, %108 : vector<2x144xf32>
    %110 = vector.extract_strided_slice %109 {offsets = [0, 0], sizes = [2, 36], strides = [1, 1]} : vector<2x144xf32> to vector<2x36xf32>
    %111 = arith.negf %110 : vector<2x36xf32>
    %112 = math.exp %111 : vector<2x36xf32>
    %cst_28 = arith.constant 1.000000e+00 : f32
    %113 = vector.broadcast %cst_28 : f32 to vector<2x36xf32>
    %114 = arith.addf %113, %112 : vector<2x36xf32>
    %115 = arith.divf %113, %114 : vector<2x36xf32>
    %116 = vector.extract_strided_slice %109 {offsets = [0, 36], sizes = [2, 36], strides = [1, 1]} : vector<2x144xf32> to vector<2x36xf32>
    %117 = arith.negf %116 : vector<2x36xf32>
    %118 = math.exp %117 : vector<2x36xf32>
    %cst_29 = arith.constant 1.000000e+00 : f32
    %119 = vector.broadcast %cst_29 : f32 to vector<2x36xf32>
    %120 = arith.addf %119, %118 : vector<2x36xf32>
    %121 = arith.divf %119, %120 : vector<2x36xf32>
    %122 = vector.extract_strided_slice %109 {offsets = [0, 72], sizes = [2, 36], strides = [1, 1]} : vector<2x144xf32> to vector<2x36xf32>
    %123 = math.tanh %122 : vector<2x36xf32>
    %124 = vector.extract_strided_slice %109 {offsets = [0, 108], sizes = [2, 36], strides = [1, 1]} : vector<2x144xf32> to vector<2x36xf32>
    %125 = arith.negf %124 : vector<2x36xf32>
    %126 = math.exp %125 : vector<2x36xf32>
    %cst_30 = arith.constant 1.000000e+00 : f32
    %127 = vector.broadcast %cst_30 : f32 to vector<2x36xf32>
    %128 = arith.addf %127, %126 : vector<2x36xf32>
    %129 = arith.divf %127, %128 : vector<2x36xf32>
    %130 = arith.mulf %121, %100 : vector<2x36xf32>
    %131 = arith.mulf %115, %123 : vector<2x36xf32>
    %132 = arith.addf %130, %131 : vector<2x36xf32>
    %133 = math.tanh %132 : vector<2x36xf32>
    %134 = arith.mulf %129, %133 : vector<2x36xf32>
    %135 = vector.extract_strided_slice %13 {offsets = [4, 0, 0], sizes = [1, 2, 144], strides = [1, 1, 1]} : vector<8x2x144xf32> to vector<1x2x144xf32>
    %136 = vector.shape_cast %135 : vector<1x2x144xf32> to vector<2x144xf32>
    %137 = vector.extract_strided_slice %13 {offsets = [3, 0, 0], sizes = [1, 2, 144], strides = [1, 1, 1]} : vector<8x2x144xf32> to vector<1x2x144xf32>
    %138 = vector.shape_cast %137 : vector<1x2x144xf32> to vector<2x144xf32>
    %139 = arith.select %33, %136, %138 : vector<2x144xi1>, vector<2x144xf32>
    %cst_31 = arith.constant dense<0.000000e+00> : vector<2x144xf32>
    %140 = tpu.matmul %134, %14, %cst_31 {dimension_numbers = #tpu.dot_dimension_numbers<[1], [0], [0], [1], [0, 0, 1, 1], [], []>} : vector<2x36xf32>, vector<36x144xf32>, vector<2x144xf32> -> vector<2x144xf32>
    %141 = arith.addf %139, %140 : vector<2x144xf32>
    %142 = vector.extract_strided_slice %141 {offsets = [0, 0], sizes = [2, 36], strides = [1, 1]} : vector<2x144xf32> to vector<2x36xf32>
    %143 = arith.negf %142 : vector<2x36xf32>
    %144 = math.exp %143 : vector<2x36xf32>
    %cst_32 = arith.constant 1.000000e+00 : f32
    %145 = vector.broadcast %cst_32 : f32 to vector<2x36xf32>
    %146 = arith.addf %145, %144 : vector<2x36xf32>
    %147 = arith.divf %145, %146 : vector<2x36xf32>
    %148 = vector.extract_strided_slice %141 {offsets = [0, 36], sizes = [2, 36], strides = [1, 1]} : vector<2x144xf32> to vector<2x36xf32>
    %149 = arith.negf %148 : vector<2x36xf32>
    %150 = math.exp %149 : vector<2x36xf32>
    %cst_33 = arith.constant 1.000000e+00 : f32
    %151 = vector.broadcast %cst_33 : f32 to vector<2x36xf32>
    %152 = arith.addf %151, %150 : vector<2x36xf32>
    %153 = arith.divf %151, %152 : vector<2x36xf32>
    %154 = vector.extract_strided_slice %141 {offsets = [0, 72], sizes = [2, 36], strides = [1, 1]} : vector<2x144xf32> to vector<2x36xf32>
    %155 = math.tanh %154 : vector<2x36xf32>
    %156 = vector.extract_strided_slice %141 {offsets = [0, 108], sizes = [2, 36], strides = [1, 1]} : vector<2x144xf32> to vector<2x36xf32>
    %157 = arith.negf %156 : vector<2x36xf32>
    %158 = math.exp %157 : vector<2x36xf32>
    %cst_34 = arith.constant 1.000000e+00 : f32
    %159 = vector.broadcast %cst_34 : f32 to vector<2x36xf32>
    %160 = arith.addf %159, %158 : vector<2x36xf32>
    %161 = arith.divf %159, %160 : vector<2x36xf32>
    %162 = arith.mulf %153, %132 : vector<2x36xf32>
    %163 = arith.mulf %147, %155 : vector<2x36xf32>
    %164 = arith.addf %162, %163 : vector<2x36xf32>
    %165 = math.tanh %164 : vector<2x36xf32>
    %166 = arith.mulf %161, %165 : vector<2x36xf32>
    %167 = vector.extract_strided_slice %13 {offsets = [3, 0, 0], sizes = [1, 2, 144], strides = [1, 1, 1]} : vector<8x2x144xf32> to vector<1x2x144xf32>
    %168 = vector.shape_cast %167 : vector<1x2x144xf32> to vector<2x144xf32>
    %169 = vector.extract_strided_slice %13 {offsets = [4, 0, 0], sizes = [1, 2, 144], strides = [1, 1, 1]} : vector<8x2x144xf32> to vector<1x2x144xf32>
    %170 = vector.shape_cast %169 : vector<1x2x144xf32> to vector<2x144xf32>
    %171 = arith.select %33, %168, %170 : vector<2x144xi1>, vector<2x144xf32>
    %cst_35 = arith.constant dense<0.000000e+00> : vector<2x144xf32>
    %172 = tpu.matmul %166, %14, %cst_35 {dimension_numbers = #tpu.dot_dimension_numbers<[1], [0], [0], [1], [0, 0, 1, 1], [], []>} : vector<2x36xf32>, vector<36x144xf32>, vector<2x144xf32> -> vector<2x144xf32>
    %173 = arith.addf %171, %172 : vector<2x144xf32>
    %174 = vector.extract_strided_slice %173 {offsets = [0, 0], sizes = [2, 36], strides = [1, 1]} : vector<2x144xf32> to vector<2x36xf32>
    %175 = arith.negf %174 : vector<2x36xf32>
    %176 = math.exp %175 : vector<2x36xf32>
    %cst_36 = arith.constant 1.000000e+00 : f32
    %177 = vector.broadcast %cst_36 : f32 to vector<2x36xf32>
    %178 = arith.addf %177, %176 : vector<2x36xf32>
    %179 = arith.divf %177, %178 : vector<2x36xf32>
    %180 = vector.extract_strided_slice %173 {offsets = [0, 36], sizes = [2, 36], strides = [1, 1]} : vector<2x144xf32> to vector<2x36xf32>
    %181 = arith.negf %180 : vector<2x36xf32>
    %182 = math.exp %181 : vector<2x36xf32>
    %cst_37 = arith.constant 1.000000e+00 : f32
    %183 = vector.broadcast %cst_37 : f32 to vector<2x36xf32>
    %184 = arith.addf %183, %182 : vector<2x36xf32>
    %185 = arith.divf %183, %184 : vector<2x36xf32>
    %186 = vector.extract_strided_slice %173 {offsets = [0, 72], sizes = [2, 36], strides = [1, 1]} : vector<2x144xf32> to vector<2x36xf32>
    %187 = math.tanh %186 : vector<2x36xf32>
    %188 = vector.extract_strided_slice %173 {offsets = [0, 108], sizes = [2, 36], strides = [1, 1]} : vector<2x144xf32> to vector<2x36xf32>
    %189 = arith.negf %188 : vector<2x36xf32>
    %190 = math.exp %189 : vector<2x36xf32>
    %cst_38 = arith.constant 1.000000e+00 : f32
    %191 = vector.broadcast %cst_38 : f32 to vector<2x36xf32>
    %192 = arith.addf %191, %190 : vector<2x36xf32>
    %193 = arith.divf %191, %192 : vector<2x36xf32>
    %194 = arith.mulf %185, %164 : vector<2x36xf32>
    %195 = arith.mulf %179, %187 : vector<2x36xf32>
    %196 = arith.addf %194, %195 : vector<2x36xf32>
    %197 = math.tanh %196 : vector<2x36xf32>
    %198 = arith.mulf %193, %197 : vector<2x36xf32>
    %199 = vector.extract_strided_slice %13 {offsets = [2, 0, 0], sizes = [1, 2, 144], strides = [1, 1, 1]} : vector<8x2x144xf32> to vector<1x2x144xf32>
    %200 = vector.shape_cast %199 : vector<1x2x144xf32> to vector<2x144xf32>
    %201 = vector.extract_strided_slice %13 {offsets = [5, 0, 0], sizes = [1, 2, 144], strides = [1, 1, 1]} : vector<8x2x144xf32> to vector<1x2x144xf32>
    %202 = vector.shape_cast %201 : vector<1x2x144xf32> to vector<2x144xf32>
    %203 = arith.select %33, %200, %202 : vector<2x144xi1>, vector<2x144xf32>
    %cst_39 = arith.constant dense<0.000000e+00> : vector<2x144xf32>
    %204 = tpu.matmul %198, %14, %cst_39 {dimension_numbers = #tpu.dot_dimension_numbers<[1], [0], [0], [1], [0, 0, 1, 1], [], []>} : vector<2x36xf32>, vector<36x144xf32>, vector<2x144xf32> -> vector<2x144xf32>
    %205 = arith.addf %203, %204 : vector<2x144xf32>
    %206 = vector.extract_strided_slice %205 {offsets = [0, 0], sizes = [2, 36], strides = [1, 1]} : vector<2x144xf32> to vector<2x36xf32>
    %207 = arith.negf %206 : vector<2x36xf32>
    %208 = math.exp %207 : vector<2x36xf32>
    %cst_40 = arith.constant 1.000000e+00 : f32
    %209 = vector.broadcast %cst_40 : f32 to vector<2x36xf32>
    %210 = arith.addf %209, %208 : vector<2x36xf32>
    %211 = arith.divf %209, %210 : vector<2x36xf32>
    %212 = vector.extract_strided_slice %205 {offsets = [0, 36], sizes = [2, 36], strides = [1, 1]} : vector<2x144xf32> to vector<2x36xf32>
    %213 = arith.negf %212 : vector<2x36xf32>
    %214 = math.exp %213 : vector<2x36xf32>
    %cst_41 = arith.constant 1.000000e+00 : f32
    %215 = vector.broadcast %cst_41 : f32 to vector<2x36xf32>
    %216 = arith.addf %215, %214 : vector<2x36xf32>
    %217 = arith.divf %215, %216 : vector<2x36xf32>
    %218 = vector.extract_strided_slice %205 {offsets = [0, 72], sizes = [2, 36], strides = [1, 1]} : vector<2x144xf32> to vector<2x36xf32>
    %219 = math.tanh %218 : vector<2x36xf32>
    %220 = vector.extract_strided_slice %205 {offsets = [0, 108], sizes = [2, 36], strides = [1, 1]} : vector<2x144xf32> to vector<2x36xf32>
    %221 = arith.negf %220 : vector<2x36xf32>
    %222 = math.exp %221 : vector<2x36xf32>
    %cst_42 = arith.constant 1.000000e+00 : f32
    %223 = vector.broadcast %cst_42 : f32 to vector<2x36xf32>
    %224 = arith.addf %223, %222 : vector<2x36xf32>
    %225 = arith.divf %223, %224 : vector<2x36xf32>
    %226 = arith.mulf %217, %196 : vector<2x36xf32>
    %227 = arith.mulf %211, %219 : vector<2x36xf32>
    %228 = arith.addf %226, %227 : vector<2x36xf32>
    %229 = math.tanh %228 : vector<2x36xf32>
    %230 = arith.mulf %225, %229 : vector<2x36xf32>
    %231 = vector.extract_strided_slice %13 {offsets = [1, 0, 0], sizes = [1, 2, 144], strides = [1, 1, 1]} : vector<8x2x144xf32> to vector<1x2x144xf32>
    %232 = vector.shape_cast %231 : vector<1x2x144xf32> to vector<2x144xf32>
    %233 = vector.extract_strided_slice %13 {offsets = [6, 0, 0], sizes = [1, 2, 144], strides = [1, 1, 1]} : vector<8x2x144xf32> to vector<1x2x144xf32>
    %234 = vector.shape_cast %233 : vector<1x2x144xf32> to vector<2x144xf32>
    %235 = arith.select %33, %232, %234 : vector<2x144xi1>, vector<2x144xf32>
    %cst_43 = arith.constant dense<0.000000e+00> : vector<2x144xf32>
    %236 = tpu.matmul %230, %14, %cst_43 {dimension_numbers = #tpu.dot_dimension_numbers<[1], [0], [0], [1], [0, 0, 1, 1], [], []>} : vector<2x36xf32>, vector<36x144xf32>, vector<2x144xf32> -> vector<2x144xf32>
    %237 = arith.addf %235, %236 : vector<2x144xf32>
    %238 = vector.extract_strided_slice %237 {offsets = [0, 0], sizes = [2, 36], strides = [1, 1]} : vector<2x144xf32> to vector<2x36xf32>
    %239 = arith.negf %238 : vector<2x36xf32>
    %240 = math.exp %239 : vector<2x36xf32>
    %cst_44 = arith.constant 1.000000e+00 : f32
    %241 = vector.broadcast %cst_44 : f32 to vector<2x36xf32>
    %242 = arith.addf %241, %240 : vector<2x36xf32>
    %243 = arith.divf %241, %242 : vector<2x36xf32>
    %244 = vector.extract_strided_slice %237 {offsets = [0, 36], sizes = [2, 36], strides = [1, 1]} : vector<2x144xf32> to vector<2x36xf32>
    %245 = arith.negf %244 : vector<2x36xf32>
    %246 = math.exp %245 : vector<2x36xf32>
    %cst_45 = arith.constant 1.000000e+00 : f32
    %247 = vector.broadcast %cst_45 : f32 to vector<2x36xf32>
    %248 = arith.addf %247, %246 : vector<2x36xf32>
    %249 = arith.divf %247, %248 : vector<2x36xf32>
    %250 = vector.extract_strided_slice %237 {offsets = [0, 72], sizes = [2, 36], strides = [1, 1]} : vector<2x144xf32> to vector<2x36xf32>
    %251 = math.tanh %250 : vector<2x36xf32>
    %252 = vector.extract_strided_slice %237 {offsets = [0, 108], sizes = [2, 36], strides = [1, 1]} : vector<2x144xf32> to vector<2x36xf32>
    %253 = arith.negf %252 : vector<2x36xf32>
    %254 = math.exp %253 : vector<2x36xf32>
    %cst_46 = arith.constant 1.000000e+00 : f32
    %255 = vector.broadcast %cst_46 : f32 to vector<2x36xf32>
    %256 = arith.addf %255, %254 : vector<2x36xf32>
    %257 = arith.divf %255, %256 : vector<2x36xf32>
    %258 = arith.mulf %249, %228 : vector<2x36xf32>
    %259 = arith.mulf %243, %251 : vector<2x36xf32>
    %260 = arith.addf %258, %259 : vector<2x36xf32>
    %261 = math.tanh %260 : vector<2x36xf32>
    %262 = arith.mulf %257, %261 : vector<2x36xf32>
    %263 = vector.extract_strided_slice %13 {offsets = [0, 0, 0], sizes = [1, 2, 144], strides = [1, 1, 1]} : vector<8x2x144xf32> to vector<1x2x144xf32>
    %264 = vector.shape_cast %263 : vector<1x2x144xf32> to vector<2x144xf32>
    %265 = vector.extract_strided_slice %13 {offsets = [7, 0, 0], sizes = [1, 2, 144], strides = [1, 1, 1]} : vector<8x2x144xf32> to vector<1x2x144xf32>
    %266 = vector.shape_cast %265 : vector<1x2x144xf32> to vector<2x144xf32>
    %267 = arith.select %33, %264, %266 : vector<2x144xi1>, vector<2x144xf32>
    %cst_47 = arith.constant dense<0.000000e+00> : vector<2x144xf32>
    %268 = tpu.matmul %262, %14, %cst_47 {dimension_numbers = #tpu.dot_dimension_numbers<[1], [0], [0], [1], [0, 0, 1, 1], [], []>} : vector<2x36xf32>, vector<36x144xf32>, vector<2x144xf32> -> vector<2x144xf32>
    %269 = arith.addf %267, %268 : vector<2x144xf32>
    %270 = vector.extract_strided_slice %269 {offsets = [0, 0], sizes = [2, 36], strides = [1, 1]} : vector<2x144xf32> to vector<2x36xf32>
    %271 = arith.negf %270 : vector<2x36xf32>
    %272 = math.exp %271 : vector<2x36xf32>
    %cst_48 = arith.constant 1.000000e+00 : f32
    %273 = vector.broadcast %cst_48 : f32 to vector<2x36xf32>
    %274 = arith.addf %273, %272 : vector<2x36xf32>
    %275 = arith.divf %273, %274 : vector<2x36xf32>
    %276 = vector.extract_strided_slice %269 {offsets = [0, 36], sizes = [2, 36], strides = [1, 1]} : vector<2x144xf32> to vector<2x36xf32>
    %277 = arith.negf %276 : vector<2x36xf32>
    %278 = math.exp %277 : vector<2x36xf32>
    %cst_49 = arith.constant 1.000000e+00 : f32
    %279 = vector.broadcast %cst_49 : f32 to vector<2x36xf32>
    %280 = arith.addf %279, %278 : vector<2x36xf32>
    %281 = arith.divf %279, %280 : vector<2x36xf32>
    %282 = vector.extract_strided_slice %269 {offsets = [0, 72], sizes = [2, 36], strides = [1, 1]} : vector<2x144xf32> to vector<2x36xf32>
    %283 = math.tanh %282 : vector<2x36xf32>
    %284 = vector.extract_strided_slice %269 {offsets = [0, 108], sizes = [2, 36], strides = [1, 1]} : vector<2x144xf32> to vector<2x36xf32>
    %285 = arith.negf %284 : vector<2x36xf32>
    %286 = math.exp %285 : vector<2x36xf32>
    %cst_50 = arith.constant 1.000000e+00 : f32
    %287 = vector.broadcast %cst_50 : f32 to vector<2x36xf32>
    %288 = arith.addf %287, %286 : vector<2x36xf32>
    %289 = arith.divf %287, %288 : vector<2x36xf32>
    %290 = arith.mulf %281, %260 : vector<2x36xf32>
    %291 = arith.mulf %275, %283 : vector<2x36xf32>
    %292 = arith.addf %290, %291 : vector<2x36xf32>
    %293 = math.tanh %292 : vector<2x36xf32>
    %294 = arith.mulf %289, %293 : vector<2x36xf32>
    %295 = arith.select %36, %70, %294 : vector<2x36xi1>, vector<2x36xf32>
    %296 = arith.select %36, %102, %262 : vector<2x36xi1>, vector<2x36xf32>
    %297 = arith.select %36, %134, %230 : vector<2x36xi1>, vector<2x36xf32>
    %298 = arith.select %36, %166, %198 : vector<2x36xi1>, vector<2x36xf32>
    %299 = arith.select %36, %198, %166 : vector<2x36xi1>, vector<2x36xf32>
    %300 = arith.select %36, %230, %134 : vector<2x36xi1>, vector<2x36xf32>
    %301 = arith.select %36, %262, %102 : vector<2x36xi1>, vector<2x36xf32>
    %302 = arith.select %36, %294, %70 : vector<2x36xi1>, vector<2x36xf32>
    %303 = vector.shape_cast %295 : vector<2x36xf32> to vector<2x1x36xf32>
    %304 = vector.shape_cast %296 : vector<2x36xf32> to vector<2x1x36xf32>
    %305 = vector.shape_cast %297 : vector<2x36xf32> to vector<2x1x36xf32>
    %306 = vector.shape_cast %298 : vector<2x36xf32> to vector<2x1x36xf32>
    %307 = vector.shape_cast %299 : vector<2x36xf32> to vector<2x1x36xf32>
    %308 = vector.shape_cast %300 : vector<2x36xf32> to vector<2x1x36xf32>
    %309 = vector.shape_cast %301 : vector<2x36xf32> to vector<2x1x36xf32>
    %310 = vector.shape_cast %302 : vector<2x36xf32> to vector<2x1x36xf32>
    %311 = tpu.concatenate %303, %304, %305, %306, %307, %308, %309, %310 in 1 : vector<2x1x36xf32>, vector<2x1x36xf32>, vector<2x1x36xf32>, vector<2x1x36xf32>, vector<2x1x36xf32>, vector<2x1x36xf32>, vector<2x1x36xf32>, vector<2x1x36xf32> -> vector<2x8x36xf32>
    %c0_51 = arith.constant 0 : index
    %c0_52 = arith.constant 0 : index
    %c0_53 = arith.constant 0 : index
    %312 = vector.load %arg6[%c0_51, %c0_52, %c0_53] : memref<2x8x36xf32, #tpu.memory_space<vmem>>, vector<2x8x36xf32>
    tpu.vector_store %arg6[%c0_51, %c0_52, %c0_53], %311 {strides = array<i32>} : memref<2x8x36xf32, #tpu.memory_space<vmem>>, vector<2x8x36xf32>,
    return
  }
}

</mosaic_0001>

<bundles_post_ra>
// kernel: lstm_block_forward.1
= control target key start
LH: loop header
LB: loop body
LE: loop exit
PB: predicated region body
PF: predicated region fallthrough
CT: control target
= control target key end

     0   :  { %s3541_s0 = inlined_call_operand.vmem [shape: f32[16,1024], index: 0, kind: input, shape index: {}]   ;;  %s3542_s1 = inlined_call_operand.vmem [shape: f32[1024,32], index: 1, kind: input, shape index: {}]   ;;  %s3543_s2 = inlined_call_operand.vmem [shape: f32[1,32], index: 2, kind: input, shape index: {}]   ;;  %s3544_s3 = inlined_call_operand.vmem [shape: f32[32,144], index: 3, kind: input, shape index: {}]   ;;  %s3545_s4 = inlined_call_operand.vmem [shape: f32[1,144], index: 4, kind: input, shape index: {}]   ;;  %s3546_s5 = inlined_call_operand.vmem [shape: f32[36,144], index: 5, kind: input, shape index: {}]   ;;  %s3547_s6 = inlined_call_operand.hbm [shape: f32[2,8,36], index: 6, kind: output, shape index: {}]  }
   0x1   :  { %v56_v0 = vld [vmem:[%s3542_s1 + $0x80] sm:$0xff]  ;;  %v57_v1 = vld [vmem:[%s3542_s1 + $0x88] sm:$0xff]  ;;  %v58_v11 = vld [vmem:[%s3542_s1 + $0x90] sm:$0xff] }
   0x2   :  { %v40_v2 = vld [vmem:[%s3542_s1] sm:$0xff]  ;;  %v2183_v3 = vpack.c.bf16 %v57_v1, %v56_v0  ;;  %v41_v4 = vld [vmem:[%s3542_s1 + $0x8] sm:$0xff]  ;;  %v59_v13 = vld [vmem:[%s3542_s1 + $0x98] sm:$0xff] }
   0x3   :  { %v88_v5 = vld [vmem:[%s3542_s1 + $0x180] sm:$0xff]  ;;  %v89_v6 = vld [vmem:[%s3542_s1 + $0x188] sm:$0xff]  ;;  %v2185_v7 = vpack.c.bf16 %v41_v4, %v40_v2  ;;  %v42_v14 = vld [vmem:[%s3542_s1 + $0x10] sm:$0xff]  ;;  %v2187_v16 = vpack.c.bf16 %v59_v13, %v58_v11 }
   0x4   :  { %v2215_v8 = vpack.c.bf16 %v89_v6, %v88_v5  ;;  %v72_v9 = vld [vmem:[%s3542_s1 + $0x100] sm:$0xff]  ;;  %v73_v10 = vld [vmem:[%s3542_s1 + $0x108] sm:$0xff]  ;;  %2184 = vmatprep.subr.bf16.mxu0 %v2183_v3  ;;  %v43_v15 = vld [vmem:[%s3542_s1 + $0x18] sm:$0xff] }
   0x5   :  { %v2217_v12 = vpack.c.bf16 %v73_v10, %v72_v9  ;;  %2186 = vmatpush3.bf16.msra.mxu0 %v2185_v7  ;;  %v2189_v17 = vpack.c.bf16 %v43_v15, %v42_v14  ;;  %v90_v18 = vld [vmem:[%s3542_s1 + $0x190] sm:$0xff]  ;;  %v91_v19 = vld [vmem:[%s3542_s1 + $0x198] sm:$0xff]  ;;  %v60_v23 = vld [vmem:[%s3542_s1 + $0xa0] sm:$0xff] }
   0x6   :  { %2216 = vmatprep.subr.bf16.mxu1 %v2215_v8  ;;  %v74_v20 = vld [vmem:[%s3542_s1 + $0x110] sm:$0xff]  ;;  %v2219_v21 = vpack.c.bf16 %v91_v19, %v90_v18  ;;  %v75_v22 = vld [vmem:[%s3542_s1 + $0x118] sm:$0xff]  ;;  %v61_v24 = vld [vmem:[%s3542_s1 + $0xa8] sm:$0xff]  ;;  %2188 = vmatprep.subr.bf16.mxu0 %v2187_v16 }
   0x7   :  { %2218 = vmatpush3.bf16.msra.mxu1 %v2217_v12  ;;  %v2221_v25 = vpack.c.bf16 %v75_v22, %v74_v20  ;;  %v2191_v26 = vpack.c.bf16 %v61_v24, %v60_v23  ;;  %v44_v27 = vld [vmem:[%s3542_s1 + $0x20] sm:$0xff]  ;;  %v45_v28 = vld [vmem:[%s3542_s1 + $0x28] sm:$0xff]  ;;  %v62_v35 = vld [vmem:[%s3542_s1 + $0xb0] sm:$0xff] }
   0x8   :  { %v92_v29 = vld [vmem:[%s3542_s1 + $0x1a0] sm:$0xff]  ;;  %2220 = vmatprep.subr.bf16.mxu1 %v2219_v21  ;;  %v93_v30 = vld [vmem:[%s3542_s1 + $0x1a8] sm:$0xff]  ;;  %v2193_v33 = vpack.c.bf16 %v45_v28, %v44_v27  ;;  %v63_v36 = vld [vmem:[%s3542_s1 + $0xb8] sm:$0xff] }
   0x9   :  { %v76_v31 = vld [vmem:[%s3542_s1 + $0x120] sm:$0xff]  ;;  %v77_v32 = vld [vmem:[%s3542_s1 + $0x128] sm:$0xff]  ;;  %2190 = vmatpush3.bf16.msra.mxu0 %v2189_v17  ;;  %v2223_v34 = vpack.c.bf16 %v93_v30, %v92_v29  ;;  %v46_v37 = vld [vmem:[%s3542_s1 + $0x30] sm:$0xff]  ;;  %v2195_v39 = vpack.c.bf16 %v63_v36, %v62_v35 }
   0xa   :  { %2192 = vmatprep.subr.bf16.mxu0 %v2191_v26  ;;  %v2225_v38 = vpack.c.bf16 %v77_v32, %v76_v31  ;;  %v47_v40 = vld [vmem:[%s3542_s1 + $0x38] sm:$0xff]  ;;  %v94_v41 = vld [vmem:[%s3542_s1 + $0x1b0] sm:$0xff]  ;;  %v64_v46 = vld [vmem:[%s3542_s1 + $0xc0] sm:$0xff] }
   0xb   :  { %2222 = vmatpush3.bf16.msra.mxu1 %v2221_v25  ;;  %v95_v42 = vld [vmem:[%s3542_s1 + $0x1b8] sm:$0xff]  ;;  %v78_v44 = vld [vmem:[%s3542_s1 + $0x130] sm:$0xff]  ;;  %v65_v47 = vld [vmem:[%s3542_s1 + $0xc8] sm:$0xff]  ;;  %v2197_v48 = vpack.c.bf16 %v47_v40, %v46_v37 }
   0xc   :  { %2224 = vmatprep.subr.bf16.mxu1 %v2223_v34  ;;  %v2227_v43 = vpack.c.bf16 %v95_v42, %v94_v41  ;;  %v79_v45 = vld [vmem:[%s3542_s1 + $0x138] sm:$0xff]  ;;  %v96_v49 = vld [vmem:[%s3542_s1 + $0x1c0] sm:$0xff]  ;;  %v97_v50 = vld [vmem:[%s3542_s1 + $0x1c8] sm:$0xff]  ;;  %v2199_v52 = vpack.c.bf16 %v65_v47, %v64_v46 }
   0xd   :  { %2194 = vmatpush3.bf16.msra.mxu0 %v2193_v33  ;;  %v2229_v51 = vpack.c.bf16 %v79_v45, %v78_v44  ;;  %v48_v53 = vld [vmem:[%s3542_s1 + $0x40] sm:$0xff]  ;;  %v49_v54 = vld [vmem:[%s3542_s1 + $0x48] sm:$0xff]  ;;  %v2231_v56 = vpack.c.bf16 %v97_v50, %v96_v49  ;;  %v66_v58 = vld [vmem:[%s3542_s1 + $0xd0] sm:$0xff] }
   0xe   :  { %2196 = vmatprep.subr.bf16.mxu0 %v2195_v39  ;;  %v80_v55 = vld [vmem:[%s3542_s1 + $0x140] sm:$0xff]  ;;  %v81_v57 = vld [vmem:[%s3542_s1 + $0x148] sm:$0xff]  ;;  %v67_v59 = vld [vmem:[%s3542_s1 + $0xd8] sm:$0xff]  ;;  %v2201_v62 = vpack.c.bf16 %v49_v54, %v48_v53 }
   0xf   :  { %2226 = vmatpush3.bf16.msra.mxu1 %v2225_v38  ;;  %v98_v60 = vld [vmem:[%s3542_s1 + $0x1d0] sm:$0xff]  ;;  %v99_v61 = vld [vmem:[%s3542_s1 + $0x1d8] sm:$0xff]  ;;  %v2233_v63 = vpack.c.bf16 %v81_v57, %v80_v55  ;;  %v2203_v0 = vpack.c.bf16 %v67_v59, %v66_v58  ;;  %v68_v6 = vld [vmem:[%s3542_s1 + $0xe0] sm:$0xff] }
  0x10   :  { %2228 = vmatprep.subr.bf16.mxu1 %v2227_v43  ;;  %v50_v1 = vld [vmem:[%s3542_s1 + $0x50] sm:$0xff]  ;;  %v51_v2 = vld [vmem:[%s3542_s1 + $0x58] sm:$0xff]  ;;  %v2235_v4 = vpack.c.bf16 %v99_v61, %v98_v60  ;;  %v69_v7 = vld [vmem:[%s3542_s1 + $0xe8] sm:$0xff] }
  0x11   :  { %2198 = vmatpush3.bf16.msra.mxu0 %v2197_v48  ;;  %v82_v3 = vld [vmem:[%s3542_s1 + $0x150] sm:$0xff]  ;;  %v83_v5 = vld [vmem:[%s3542_s1 + $0x158] sm:$0xff]  ;;  %v100_v8 = vld [vmem:[%s3542_s1 + $0x1e0] sm:$0xff]  ;;  %v2205_v10 = vpack.c.bf16 %v51_v2, %v50_v1  ;;  %v2207_v14 = vpack.c.bf16 %v69_v7, %v68_v6 }
  0x12   :  { %2200 = vmatprep.subr.bf16.mxu0 %v2199_v52  ;;  %v101_v9 = vld [vmem:[%s3542_s1 + $0x1e8] sm:$0xff]  ;;  %v52_v11 = vld [vmem:[%s3542_s1 + $0x60] sm:$0xff]  ;;  %v2237_v13 = vpack.c.bf16 %v83_v5, %v82_v3  ;;  %v70_v19 = vld [vmem:[%s3542_s1 + $0xf0] sm:$0xff] }
  0x13   :  { %2230 = vmatpush3.bf16.msra.mxu1 %v2229_v51  ;;  %v53_v12 = vld [vmem:[%s3542_s1 + $0x68] sm:$0xff]  ;;  %v84_v15 = vld [vmem:[%s3542_s1 + $0x160] sm:$0xff]  ;;  %v2239_v18 = vpack.c.bf16 %v101_v9, %v100_v8  ;;  %v71_v20 = vld [vmem:[%s3542_s1 + $0xf8] sm:$0xff] }
  0x14   :  { %2232 = vmatprep.subr.bf16.mxu1 %v2231_v56  ;;  %v85_v16 = vld [vmem:[%s3542_s1 + $0x168] sm:$0xff]  ;;  %v27_v21 = vld [vmem:[%s3541_s0 + $0x18] sm:$0xff]  ;;  %v102_v22 = vld [vmem:[%s3542_s1 + $0x1f0] sm:$0xff]  ;;  %v2209_v24 = vpack.c.bf16 %v53_v12, %v52_v11  ;;  %v2211_v26 = vpack.c.bf16 %v71_v20, %v70_v19 }
  0x15   :  { %2202 = vmatpush3.bf16.msra.mxu0 %v2201_v62  ;;  %v25_v17 = vld [vmem:[%s3541_s0 + $0x8] sm:$0xff]  ;;  %v103_v23 = vld [vmem:[%s3542_s1 + $0x1f8] sm:$0xff]  ;;  %314 = vmatprep.mubr.f32.mxu1 %v27_v21  ;;  %v2241_v25 = vpack.c.bf16 %v85_v16, %v84_v15  ;;  %v54_v27 = vld [vmem:[%s3542_s1 + $0x70] sm:$0xff] }
  0x16   :  { %2204 = vmatprep.subr.bf16.mxu0 %v2203_v0  ;;  %239 = vmatprep.mubr.f32.mxu0 %v25_v17  ;;  %v55_v28 = vld [vmem:[%s3542_s1 + $0x78] sm:$0xff]  ;;  %v86_v29 = vld [vmem:[%s3542_s1 + $0x170] sm:$0xff]  ;;  %v2243_v30 = vpack.c.bf16 %v103_v23, %v102_v22  ;;  %v120_v32 = vld [vmem:[%s3542_s1 + $0x280] sm:$0xff] }
  0x17   :  { %2234 = vmatpush3.bf16.msra.mxu1 %v2233_v63  ;;  %v87_v31 = vld [vmem:[%s3542_s1 + $0x178] sm:$0xff]  ;;  %v121_v33 = vld [vmem:[%s3542_s1 + $0x288] sm:$0xff]  ;;  %v152_v34 = vld [vmem:[%s3542_s1 + $0x380] sm:$0xff]  ;;  %v2213_v36 = vpack.c.bf16 %v55_v28, %v54_v27 }
  0x18   :  { %2236 = vmatprep.subr.bf16.mxu1 %v2235_v4  ;;  %v153_v35 = vld [vmem:[%s3542_s1 + $0x388] sm:$0xff]  ;;  %v2245_v37 = vpack.c.bf16 %v87_v31, %v86_v29  ;;  %v2247_v38 = vpack.c.bf16 %v121_v33, %v120_v32  ;;  %v104_v39 = vld [vmem:[%s3542_s1 + $0x200] sm:$0xff]  ;;  %v122_v44 = vld [vmem:[%s3542_s1 + $0x290] sm:$0xff] }
  0x19   :  { %2206 = vmatpush3.bf16.msra.mxu0 %v2205_v10  ;;  %v105_v40 = vld [vmem:[%s3542_s1 + $0x208] sm:$0xff]  ;;  %v136_v41 = vld [vmem:[%s3542_s1 + $0x300] sm:$0xff]  ;;  %v2279_v42 = vpack.c.bf16 %v153_v35, %v152_v34  ;;  %v123_v45 = vld [vmem:[%s3542_s1 + $0x298] sm:$0xff] }
  0x1a   :  { %2208 = vmatprep.subr.bf16.mxu0 %v2207_v14  ;;  %v137_v43 = vld [vmem:[%s3542_s1 + $0x308] sm:$0xff]  ;;  %v154_v46 = vld [vmem:[%s3542_s1 + $0x390] sm:$0xff]  ;;  %v155_v47 = vld [vmem:[%s3542_s1 + $0x398] sm:$0xff]  ;;  %v2249_v49 = vpack.c.bf16 %v105_v40, %v104_v39  ;;  %v2251_v52 = vpack.c.bf16 %v123_v45, %v122_v44 }
  0x1b   :  { %2238 = vmatpush3.bf16.msra.mxu1 %v2237_v13  ;;  %v24_v48 = vld [vmem:[%s3541_s0] sm:$0xff]  ;;  %v26_v50 = vld [vmem:[%s3541_s0 + $0x10] sm:$0xff]  ;;  %v2281_v51 = vpack.c.bf16 %v137_v43, %v136_v41  ;;  %v107_v54 = vld [vmem:[%s3542_s1 + $0x218] sm:$0xff]  ;;  %v2283_v56 = vpack.c.bf16 %v155_v47, %v154_v46 }
  0x1c   :  { %2240 = vmatprep.subr.bf16.mxu1 %v2239_v18  ;;  %v106_v53 = vld [vmem:[%s3542_s1 + $0x210] sm:$0xff]  ;;  %v139_v57 = vld [vmem:[%s3542_s1 + $0x318] sm:$0xff]  ;;  %v124_v58 = vld [vmem:[%s3542_s1 + $0x2a0] sm:$0xff] }
  0x1d   :  { %2210 = vmatpush3.bf16.msra.mxu0 %v2209_v24  ;;  %v138_v55 = vld [vmem:[%s3542_s1 + $0x310] sm:$0xff]  ;;  %v125_v59 = vld [vmem:[%s3542_s1 + $0x2a8] sm:$0xff]  ;;  %v156_v60 = vld [vmem:[%s3542_s1 + $0x3a0] sm:$0xff]  ;;  %v2253_v62 = vpack.c.bf16 %v107_v54, %v106_v53 }
  0x1e   :  { %2212 = vmatprep.subr.bf16.mxu0 %v2211_v26  ;;  %v157_v61 = vld [vmem:[%s3542_s1 + $0x3a8] sm:$0xff]  ;;  %v2285_v63 = vpack.c.bf16 %v139_v57, %v138_v55  ;;  %v2255_v0 = vpack.c.bf16 %v125_v59, %v124_v58  ;;  %v108_v1 = vld [vmem:[%s3542_s1 + $0x220] sm:$0xff]  ;;  %v126_v6 = vld [vmem:[%s3542_s1 + $0x2b0] sm:$0xff] }
  0x1f   :  { %2242 = vmatpush3.bf16.msra.mxu1 %v2241_v25  ;;  %v109_v2 = vld [vmem:[%s3542_s1 + $0x228] sm:$0xff]  ;;  %v140_v3 = vld [vmem:[%s3542_s1 + $0x320] sm:$0xff]  ;;  %v2287_v4 = vpack.c.bf16 %v157_v61, %v156_v60  ;;  %v127_v7 = vld [vmem:[%s3542_s1 + $0x2b8] sm:$0xff] }
  0x20   :  { %2244 = vmatprep.subr.bf16.mxu1 %v2243_v30  ;;  %v141_v5 = vld [vmem:[%s3542_s1 + $0x328] sm:$0xff]  ;;  %v158_v8 = vld [vmem:[%s3542_s1 + $0x3b0] sm:$0xff]  ;;  %v159_v9 = vld [vmem:[%s3542_s1 + $0x3b8] sm:$0xff]  ;;  %v2257_v10 = vpack.c.bf16 %v109_v2, %v108_v1  ;;  %v2259_v15 = vpack.c.bf16 %v127_v7, %v126_v6 }
  0x21   :  { %2214 = vmatpush3.bf16.msra.mxu0 %v2213_v36  ;;  %v110_v11 = vld [vmem:[%s3542_s1 + $0x230] sm:$0xff]  ;;  %v111_v12 = vld [vmem:[%s3542_s1 + $0x238] sm:$0xff]  ;;  %v33_v13 = vld [vmem:[%s3541_s0 + $0x48] sm:$0xff]  ;;  %v2289_v14 = vpack.c.bf16 %v141_v5, %v140_v3  ;;  %v2291_v19 = vpack.c.bf16 %v159_v9, %v158_v8 }
  0x22   :  { %2248 = vmatprep.subr.bf16.mxu0 %v2247_v38  ;;  %v142_v16 = vld [vmem:[%s3542_s1 + $0x330] sm:$0xff]  ;;  %v143_v17 = vld [vmem:[%s3542_s1 + $0x338] sm:$0xff]  ;;  %v32_v18 = vld [vmem:[%s3541_s0 + $0x40] sm:$0xff]  ;;  %v2261_v26 = vpack.c.bf16 %v111_v12, %v110_v11 }
  0x23   :  { %2246 = vmatpush3.bf16.msra.mxu1 %v2245_v37  ;;  %v128_v20 = vld [vmem:[%s3542_s1 + $0x2c0] sm:$0xff]  ;;  %v129_v21 = vld [vmem:[%s3542_s1 + $0x2c8] sm:$0xff]  ;;  %v35_v22 = vld [vmem:[%s3541_s0 + $0x58] sm:$0xff]  ;;  %v2293_v29 = vpack.c.bf16 %v143_v17, %v142_v16 }
  0x24   :  { %2280 = vmatprep.subr.bf16.mxu1 %v2279_v42  ;;  %240 = vmatmul.mubr.f32.vlgmr.msra.gmra.mrb[0].mxu0 %v24_v48  ;;  %v160_v23 = vld [vmem:[%s3542_s1 + $0x3c0] sm:$0xff]  ;;  %v161_v24 = vld [vmem:[%s3542_s1 + $0x3c8] sm:$0xff]  ;;  %v34_v25 = vld [vmem:[%s3541_s0 + $0x50] sm:$0xff]  ;;  %v2263_v30 = vpack.c.bf16 %v129_v21, %v128_v20 }
  0x25   :  { %2250 = vmatpush3.bf16.msra.mxu0 %v2249_v49  ;;  %244 = vmatprep.mubr.f32.mxu0 %v33_v13  ;;  %v112_v27 = vld [vmem:[%s3542_s1 + $0x240] sm:$0xff]  ;;  %v113_v28 = vld [vmem:[%s3542_s1 + $0x248] sm:$0xff]  ;;  %v2295_v34 = vpack.c.bf16 %v161_v24, %v160_v23  ;;  %v130_v35 = vld [vmem:[%s3542_s1 + $0x2d0] sm:$0xff] }
  0x26   :  { %315 = vmatmul.mubr.f32.vlgmr.msra.gmra.mrb[0].mxu1 %v26_v50  ;;  %2252 = vmatprep.subr.bf16.mxu0 %v2251_v52  ;;  %v144_v31 = vld [vmem:[%s3542_s1 + $0x340] sm:$0xff]  ;;  %v145_v32 = vld [vmem:[%s3542_s1 + $0x348] sm:$0xff]  ;;  %v131_v36 = vld [vmem:[%s3542_s1 + $0x2d8] sm:$0xff]  ;;  %v2265_v40 = vpack.c.bf16 %v113_v28, %v112_v27 }
  0x27   :  { %2282 = vmatpush3.bf16.msra.mxu1 %v2281_v51  ;;  %319 = vmatprep.mubr.f32.mxu1 %v35_v22  ;;  %v29_v33 = vld [vmem:[%s3541_s0 + $0x28] sm:$0xff]  ;;  %v31_v37 = vld [vmem:[%s3541_s0 + $0x38] sm:$0xff]  ;;  %v162_v38 = vld [vmem:[%s3542_s1 + $0x3d0] sm:$0xff] }
  0x28   :  { %2284 = vmatprep.subr.bf16.mxu1 %v2283_v56  ;;  %245 = vmatmul.mubr.f32.gmra.mrb[2].mxu0 %v32_v18  ;;  %v163_v39 = vld [vmem:[%s3542_s1 + $0x3d8] sm:$0xff] }
  0x29   :  { %2254 = vmatpush3.bf16.msra.mxu0 %v2253_v62  ;;  %389 = vmatprep.mubr.f32.mxu0 %v29_v33 }
  0x2a   :  { %2256 = vmatprep.subr.bf16.mxu0 %v2255_v0  ;;  %320 = vmatmul.mubr.f32.gmra.mrb[2].mxu1 %v34_v25 }
  0x2b   :  { %2286 = vmatpush3.bf16.msra.mxu1 %v2285_v63  ;;  %464 = vmatprep.mubr.f32.mxu1 %v31_v37 }
  0x2c   :  { %2288 = vmatprep.subr.bf16.mxu1 %v2287_v4 }
  0x2d   :  { %2258 = vmatpush3.bf16.msra.mxu0 %v2257_v10 }
  0x2e   :  { %2260 = vmatprep.subr.bf16.mxu0 %v2259_v15 }
  0x2f   :  { %2290 = vmatpush3.bf16.msra.mxu1 %v2289_v14 }
  0x30   :  { %2292 = vmatprep.subr.bf16.mxu1 %v2291_v19 }
  0x31   :  { %2262 = vmatpush3.bf16.msra.mxu0 %v2261_v26 }
  0x32   :  { %11 = vsyncpa [#allocation3], 0  ;;  %2264 = vmatprep.subr.bf16.mxu0 %v2263_v30  ;;  %v2297_v41 = vpack.c.bf16 %v145_v32, %v144_v31  ;;  %v2267_v42 = vpack.c.bf16 %v131_v36, %v130_v35  ;;  %v114_v43 = vld [vmem:[%s3542_s1 + $0x250] sm:$0xff]  ;;  %v115_v44 = vld [vmem:[%s3542_s1 + $0x258] sm:$0xff]  ;;  %v2299_v46 = vpack.c.bf16 %v163_v39, %v162_v38  ;;  %v2517_v28 = vmov 0.0   ;;  %s2520_s30 = smov 36  }
  0x33   :  { %2294 = vmatpush3.bf16.msra.mxu1 %v2293_v29  ;;  %v146_v45 = vld [vmem:[%s3542_s1 + $0x350] sm:$0xff]  ;;  %v147_v47 = vld [vmem:[%s3542_s1 + $0x358] sm:$0xff]  ;;  %v132_v48 = vld [vmem:[%s3542_s1 + $0x2e0] sm:$0xff]  ;;  %v2269_v52 = vpack.c.bf16 %v115_v44, %v114_v43  ;;  %vm695_vm0 = vcmask 1043456   ;;  %vm497_vm1 = vcmask 261120   ;;  %s2521_s7 = smov 72  }
  0x34   :  { %2296 = vmatprep.subr.bf16.mxu1 %v2295_v34  ;;  %v133_v49 = vld [vmem:[%s3542_s1 + $0x2e8] sm:$0xff]  ;;  %v164_v50 = vld [vmem:[%s3542_s1 + $0x3e0] sm:$0xff]  ;;  %v2301_v53 = vpack.c.bf16 %v147_v47, %v146_v45  ;;  %v134_v60 = vld [vmem:[%s3542_s1 + $0x2f0] sm:$0xff]  ;;  %s2522_s8 = smov 20   ;;  %vm834_vm10 = vcmask 162816   ;;  %vm691_vm11 = vcmask 293888  }
  0x35   :  { %v165_v51 = vld [vmem:[%s3542_s1 + $0x3e8] sm:$0xff]  ;;  %2266 = vmatpush3.bf16.msra.mxu0 %v2265_v40  ;;  %v2271_v54 = vpack.c.bf16 %v133_v49, %v132_v48  ;;  %v116_v55 = vld [vmem:[%s3542_s1 + $0x260] sm:$0xff]  ;;  %v135_v61 = vld [vmem:[%s3542_s1 + $0x2f8] sm:$0xff]  ;;  %vm1951_vm13 = vcmask 1040384   ;;  %vm1954_vm14 = vcmask 1041408   ;;  %vm1957_vm15 = vcmask 1042432  }
  0x36   :  { %2268 = vmatprep.subr.bf16.mxu0 %v2267_v42  ;;  %v117_v56 = vld [vmem:[%s3542_s1 + $0x268] sm:$0xff]  ;;  %v148_v57 = vld [vmem:[%s3542_s1 + $0x360] sm:$0xff]  ;;  %v2303_v58 = vpack.c.bf16 %v165_v51, %v164_v50  ;;  %v166_v62 = vld [vmem:[%s3542_s1 + $0x3f0] sm:$0xff]  ;;  %v2275_v2 = vpack.c.bf16 %v135_v61, %v134_v60  ;;  %s2524_s9 = smov [#allocation2]  }
  0x37   :  { %2298 = vmatpush3.bf16.msra.mxu1 %v2297_v41  ;;  %v149_v59 = vld [vmem:[%s3542_s1 + $0x368] sm:$0xff]  ;;  %v167_v63 = vld [vmem:[%s3542_s1 + $0x3f8] sm:$0xff]  ;;  %v2273_v0 = vpack.c.bf16 %v117_v56, %v116_v55  ;;  %v118_v3 = vld [vmem:[%s3542_s1 + $0x270] sm:$0xff]  ;;  %s1978_s10 = sshll.u32 %s2524_s9, 4  ;;  %s1979_s10 = int_to_ptr.vmem [resolvable:$true] %s1978_s10 }
  0x38   :  { %2300 = vmatprep.subr.bf16.mxu1 %v2299_v46  ;;  %v2305_v1 = vpack.c.bf16 %v149_v59, %v148_v57  ;;  %v119_v4 = vld [vmem:[%s3542_s1 + $0x278] sm:$0xff]  ;;  %v2307_v5 = vpack.c.bf16 %v167_v63, %v166_v62  ;;  %v150_v6 = vld [vmem:[%s3542_s1 + $0x370] sm:$0xff]  ;;  %v28_v10 = vld [vmem:[%s3541_s0 + $0x20] sm:$0xff]  ;;  %s2493_s11 = scalar_lea.vmem %s1979_s10, 256  ;;  %p2498_p1 = scmp.lt.s32.totalorder %s1979_s10, %s1979_s10 }
  0x39   :  { %2270 = vmatpush3.bf16.msra.mxu0 %v2269_v52  ;;  %v151_v7 = vld [vmem:[%s3542_s1 + $0x378] sm:$0xff]  ;;  %v2277_v8 = vpack.c.bf16 %v119_v4, %v118_v3  ;;  %v30_v11 = vld [vmem:[%s3541_s0 + $0x30] sm:$0xff]  ;;  %v37_v12 = vld [vmem:[%s3541_s0 + $0x68] sm:$0xff]  ;;  %p2494_p0 = scmp.ne.s32.totalorder %s1979_s10, %s2493_s11  ;;  %p2499_p2 = scmp.lt.s32.totalorder %s2493_s11, %s2493_s11 }
  0x3a   :  { %2272 = vmatprep.subr.bf16.mxu0 %v2271_v54  ;;  %v2309_v9 = vpack.c.bf16 %v151_v7, %v150_v6  ;;  %v39_v13 = vld [vmem:[%s3541_s0 + $0x78] sm:$0xff]  ;;  %v36_v14 = vld [vmem:[%s3541_s0 + $0x60] sm:$0xff]  ;;  %v38_v15 = vld [vmem:[%s3541_s0 + $0x70] sm:$0xff] }
  0x3b   :  { %2302 = vmatpush3.bf16.msra.mxu1 %v2301_v53  ;;  %v478_v16 = vld [vmem:[%s3544_s3 + $0x8] sm:$0xff]  ;;  %v480_v17 = vld [vmem:[%s3544_s3 + $0x18] sm:$0xff]  ;;  %v477_v19 = vld [vmem:[%s3544_s3] sm:$0xff]  ;;  %p2500_p3 = por %p2499_p2, %p2498_p1 }
  0x3c   :  { %2304 = vmatprep.subr.bf16.mxu1 %v2303_v58  ;;  %v2311_v18 = vpack.c.bf16 %v480_v17, %v478_v16  ;;  %v479_v20 = vld [vmem:[%s3544_s3 + $0x10] sm:$0xff]  ;;  %v482_v22 = vld [vmem:[%s3544_s3 + $0x28] sm:$0xff]  ;;  %v484_v23 = vld [vmem:[%s3544_s3 + $0x38] sm:$0xff]  ;;  %v487_v16 = vlaneseq }
  0x3d   :  { %2274 = vmatpush3.bf16.msra.mxu0 %v2273_v0  ;;  %v2313_v21 = vpack.c.bf16 %v479_v20, %v477_v19  ;;  %v2315_v24 = vpack.c.bf16 %v484_v23, %v482_v22  ;;  %v481_v25 = vld [vmem:[%s3544_s3 + $0x20] sm:$0xff]  ;;  %v483_v26 = vld [vmem:[%s3544_s3 + $0x30] sm:$0xff]  ;;  %v622_v29 = vld [vmem:[%s3546_s5 + $0x8] sm:$0xff]  ;;  %p2501_p4 = pnand %p2500_p3, %p2494_p0 }
  0x3e   :  { %2276 = vmatprep.subr.bf16.mxu0 %v2275_v2  ;;  %v2317_v27 = vpack.c.bf16 %v483_v26, %v481_v25  ;;  %v624_v30 = vld [vmem:[%s3546_s5 + $0x18] sm:$0xff]  ;;  %v621_v32 = vld [vmem:[%s3546_s5] sm:$0xff]  ;;  %v623_v33 = vld [vmem:[%s3546_s5 + $0x10] sm:$0xff]  ;;  %v3099_v17 = vand.u32 127, %v487_v16 }
  0x3f   :  { %2306 = vmatpush3.bf16.msra.mxu1 %v2305_v1  ;;  %v3026_v31 = vpack.c.bf16 %v624_v30, %v622_v29  ;;  %v3034_v34 = vpack.c.bf16 %v623_v33, %v621_v32  ;;  %v626_v35 = vld [vmem:[%s3546_s5 + $0x28] sm:$0xff]  ;;  %v628_v36 = vld [vmem:[%s3546_s5 + $0x38] sm:$0xff]  ;;  %v625_v37 = vld [vmem:[%s3546_s5 + $0x20] sm:$0xff]  ;;  %v2518_v33 = vmov 1983009808  }
  0x40   :  { %2308 = vmatprep.subr.bf16.mxu1 %v2307_v5  ;;  %v3046_v38 = vpack.c.bf16 %v628_v36, %v626_v35  ;;  %v627_v39 = vld [vmem:[%s3546_s5 + $0x30] sm:$0xff]  ;;  %v3059_v41 = vld [vmem:[%s3546_s5 + $0x48] sm:$0xf]  ;;  %v3067_v42 = vld [vmem:[%s3546_s5 + $0x40] sm:$0xf]  ;;  %v588_v35 = vunpack.c.l.s4 %v2518_v33  ;;  %vm668_vm12 = vcmp.lt.s32.totalorder %v3099_v17, 18 }
  0x41   :  { %2278 = vmatpush3.bf16.msra.mxu0 %v2277_v8  ;;  %v3053_v40 = vpack.c.bf16 %v627_v39, %v625_v37  ;;  %v1989_v44 = vld [vmem:[%s3543_s2] ss:$0 sm:$0xff]  ;;  %v3103_v19 = vmul.u32.u64.low 3817748708, %v3099_v17  ;;  %v3104_v20 = vmul.u32.u64.high 3817748708, %v3099_v17, %v3103_v19 }
  0x42   :  { %2312 = vmatprep.subr.bf16.mxu0 %v2311_v18  ;;  %v633_v18 = vadd.s32 128, %v3099_v17  ;;  %v485_v30 = vld [vmem:[%s3545_s4] sm:$0x3]  ;;  %s2519_s4 = smov 56  }
  0x43   :  { %2310 = vmatpush3.bf16.msra.mxu1 %v2309_v9  ;;  %v640_v23 = vshrl.u32 %v3104_v20, 5 }
  0x44   :  { %390 = vmatmul.mubr.f32.vlgmr.msra.gmra.mrb[4].mxu0 %v28_v10  ;;  %2320 = vmatprep.subr.bf16.mxu1 %v3026_v31 }
  0x45   :  { %394 = vmatprep.mubr.f32.mxu0 %v37_v12  ;;  %2314 = vmatpush1.bf16.msra.mxu0 %v2313_v21  ;;  %v3106_v21 = vmul.u32.u64.low 3817748708, %v633_v18  ;;  %v3107_v22 = vmul.u32.u64.high 3817748708, %v633_v18, %v3106_v21  ;;  %v641_v26 = vmul.u32 36, %v640_v23 }
  0x46   :  { %465 = vmatmul.mubr.f32.vlgmr.msra.gmra.mrb[4].mxu1 %v30_v11  ;;  %2316 = vmatprep.subr.bf16.mxu0 %v2315_v24  ;;  %v3110_v24 = vshrl.u32 %v487_v16, 7 }
  0x47   :  { %469 = vmatprep.mubr.f32.mxu1 %v39_v13  ;;  %2322 = vmatpush1.bf16.msra.mxu1 %v3034_v34  ;;  %v651_v25 = vshrl.u32 %v3107_v22, 5  ;;  %v642_v36 = vsub.s32 %v3099_v17, %v641_v26 }
  0x48   :  { %395 = vmatmul.mubr.f32.gmra.mrb[6].mxu0 %v36_v14  ;;  %2324 = vmatprep.subr.bf16.mxu1 %v3046_v38  ;;  %v493_v32 = vsub.s32 1, %v3110_v24 }
  0x49   :  { %2318 = vmatpush1.bf16.msra.mxu0 %v2317_v27  ;;  %568 = vmatprep.mubr.f32.mxu0 %v2517_v28  ;;  %v3114_v27 = vsub.s32 0, %v3110_v24  ;;  %v652_v29 = vmul.u32 36, %v651_v25  ;;  %vm656_vm2 = vcmp.ne.s32.totalorder %v642_v36, 0  ;;  %vm658_vm3 = vcmp.lt.s32.totalorder %v642_v36, 0 }
  0x4a   :  { %470 = vmatmul.mubr.f32.gmra.mrb[6].mxu1 %v38_v15  ;;  %2328 = vmatprep.subr.bf16.mxu0 %v3026_v31  ;;  %vm3123_vm6 = vmand %vm658_vm3, %vm656_vm2  ;;  %vm1965_vm2 = vcmask 1045504   ;;  %vm1968_vm3 = vcmask 1046528  }
  0x4b   :  { %766 = vmatprep.mubr.f32.mxu1 %v2517_v28  ;;  %2326 = vmatpush1.bf16.msra.mxu1 %v3053_v40  ;;  %v490_v37 = vrot.slane %v485_v30, %v3114_v27  ;;  %v653_v39 = vsub.s32 %v633_v18, %v652_v29 }
  0x4c   :  { %1992 = vmatprep.subr.msk.mxu1 %vm695_vm0, %v3059_v41 }
  0x4d   :  { %vm657_vm4 = vcmp.ne.s32.totalorder %v653_v39, 0  ;;  %vm659_vm5 = vcmp.lt.s32.totalorder %v653_v39, 0 }
  0x4e   :  { %vm3127_vm7 = vmand %vm659_vm5, %vm657_vm4 }
  0x4f   :  { %1993 = vmatpush1.msk.msra.mxu1 %vm695_vm0, %v3067_v42 }
  0x50   :  { %767 = vmatmul.mubr.f32.vlgmr.msra.gmra.mrb[8].mxu1 %v2517_v28  ;;  %2336 = vmatprep.subr.bf16.mxu1 %v3026_v31 }
  0x51   :  { %2338 = vmatpush1.bf16.msra.mxu1 %v3034_v34  ;;  %1037 = vmatprep.mubr.f32.mxu1 %v2517_v28 }
  0x52   :  { %2340 = vmatprep.subr.bf16.mxu1 %v3046_v38 }
  0x55   :  { %2342 = vmatpush1.bf16.msra.mxu1 %v3053_v40 }
  0x56   :  { %2001 = vmatprep.subr.msk.mxu1 %vm695_vm0, %v3059_v41 }
  0x59   :  { %2002 = vmatpush1.msk.msra.mxu1 %vm695_vm0, %v3067_v42 }
  0x5a   :  { %2352 = vmatprep.subr.bf16.mxu1 %v3026_v31 }
  0xf7   :  { %v2063_v43 = vpop.f32.mrb[0].mxu0 }
  0xf8   :  { %v2064_v45 = vpop.f32.mrb[1].mxu0 }
  0xf9   :  { %v2101_v46 = vpop.f32.mrb[0].mxu1  ;;  %v2065_v47 = vadd.f32 %v2064_v45, %v2063_v43  ;;  %v494_v43 = vrot.slane %v485_v30, %v493_v32 }
  0xfa   :  { %v2102_v48 = vpop.f32.mrb[1].mxu1 }
  0xfb   :  { %v2103_v49 = vadd.f32 %v2102_v48, %v2101_v46  ;;  %v242_v50 = vadd.f32 %v2065_v47, %v1989_v44  ;;  %v2066_v52 = vpop.f32.mrb[2].mxu0 }
  0xfc   :  { %v2067_v53 = vpop.f32.mrb[3].mxu0 }
  0xfd   :  { %v317_v51 = vadd.f32 %v2103_v49, %v242_v50  ;;  %v2104_v54 = vpop.f32.mrb[2].mxu1  ;;  %v2068_v55 = vadd.f32 %v2067_v53, %v2066_v52  ;;  %v663_v52 = vadd.s32 36, %v653_v39 }
  0xfe   :  { %v2105_v56 = vpop.f32.mrb[3].mxu1 }
  0xff   :  { %v2106_v57 = vadd.f32 %v2105_v56, %v2104_v54  ;;  %v247_v58 = vadd.f32 %v2068_v55, %v1989_v44  ;;  %v589_v44 = vunpack.c.0.s8 %v588_v35 }
 0x101   :  { %v322_v59 = vadd.f32 %v2106_v57, %v247_v58  ;;  %v592_v49 = vsub.s32 %v589_v44, %v3110_v24 }
 0x117   :  { %v2139_v60 = vpop.f32.mrb[4].mxu0 }
 0x118   :  { %v2140_v61 = vpop.f32.mrb[5].mxu0 }
 0x119   :  { %v2177_v62 = vpop.f32.mrb[4].mxu1  ;;  %v2141_v63 = vadd.f32 %v2140_v61, %v2139_v60 }
 0x11a   :  { %v2178_v0 = vpop.f32.mrb[5].mxu1 }
 0x11b   :  { %v2179_v1 = vadd.f32 %v2178_v0, %v2177_v62  ;;  %v392_v2 = vadd.f32 %v2141_v63, %v317_v51  ;;  %v2142_v3 = vpop.f32.mrb[6].mxu0  ;;  %v662_v51 = vadd.s32 36, %v642_v36  ;;  %v665_v63 = vsel %vm3127_vm7, %v663_v52, %v653_v39 }
 0x11c   :  { %v2143_v4 = vpop.f32.mrb[7].mxu0  ;;  %vm3147_vm9 = vcmp.ge.s32.totalorder %v665_v63, 18 }
 0x11d   :  { %v2180_v5 = vpop.f32.mrb[6].mxu1  ;;  %v467_v6 = vadd.f32 %v2179_v1, %v392_v2  ;;  %v2144_v7 = vadd.f32 %v2143_v4, %v2142_v3  ;;  %v664_v62 = vsel %vm3123_vm6, %v662_v51, %v642_v36 }
 0x11e   :  { %v2181_v8 = vpop.f32.mrb[7].mxu1  ;;  %vm3143_vm8 = vcmp.ge.s32.totalorder %v664_v62, 18 }
 0x11f   :  { %v2182_v9 = vadd.f32 %v2181_v8, %v2180_v5  ;;  %v475_v10 = vmax.f32 %v467_v6, 0.0  ;;  %v397_v11 = vadd.f32 %v2144_v7, %v322_v59 }
 0x121   :  { %v472_v12 = vadd.f32 %v2182_v9, %v397_v11  ;;  %1990 = vmatmul.mubr.msk.f32.vlgmr.msra.gmra.mrb[8].mxu0 %vm497_vm1, %v475_v10 }
 0x122   :  { %574 = vmatprep.mubr.f32.mxu0 %v2517_v28  ;;  %2330 = vmatpush1.bf16.msra.mxu0 %v3034_v34 }
 0x123   :  { %v476_v13 = vmax.f32 %v472_v12, 0.0  ;;  %2332 = vmatprep.subr.bf16.mxu0 %v3046_v38  ;;  %v3095_v14 = vpop.f32.mrb[8].mxu1 }
 0x124   :  { %v3097_v15 = vpop.f32.mrb[9].mxu1 }
 0x125   :  { %1991 = vmatmul.mubr.msk.f32.gmra.mrb[10].mxu0 %vm497_vm1, %v476_v13  ;;  %vm1962_vm1 = vcmask 1044480  }
 0x126   :  { %2334 = vmatpush1.bf16.msra.mxu0 %v3053_v40  ;;  %902 = vmatprep.mubr.f32.mxu0 %v2517_v28 }
 0x127   :  { %1996 = vmatprep.subr.msk.mxu0 %vm695_vm0, %v3059_v41 }
 0x12a   :  { %1997 = vmatpush1.msk.msra.mxu0 %vm695_vm0, %v3067_v42 }
 0x12b   :  { %2344 = vmatprep.subr.bf16.mxu0 %v3026_v31 }
 0x1f4   :  { %v570_v45 = vpop.f32.mrb[8].mxu0 }
 0x1f5   :  { %v571_v46 = vadd.f32 %v570_v45, %v490_v37  ;;  %v572_v47 = vpop.f32.mrb[9].mxu0 }
 0x1f6   :  { %v573_v48 = vadd.f32 %v572_v47, %v494_v43 }
 0x1f8   :  { %v585_v53 = vcombine.low %v571_v46, %v573_v48  ;;  %v586_v54 = vcombine.high %v571_v46, %v573_v48  ;;  %v576_v55 = vpop.f32.mrb[10].mxu0 }
 0x1f9   :  { %v577_v57 = vadd.f32 %v576_v55, %v490_v37  ;;  %v578_v58 = vpop.f32.mrb[11].mxu0 }
 0x1fa   :  { %v593_v59 = vrot.slane %v585_v53, %v592_v49  ;;  %v600_v60 = vrot.slane %v586_v54, %v592_v49  ;;  %v579_v61 = vadd.f32 %v578_v58, %v494_v43 }
 0x1fc   :  { %v601_v0 = vcombine.high %v593_v59, %v593_v59  ;;  %v602_v1 = vcombine.high %v600_v60, %v600_v60  ;;  %v603_v2 = vcombine.low %v577_v57, %v579_v61  ;;  %v604_v3 = vcombine.high %v577_v57, %v579_v61 }
 0x1fd   :  { %v3135_v4 = vrot.slane %v593_v59, %v592_v49  ;;  %v3137_v5 = vrot.slane %v600_v60, %v592_v49 }
 0x1fe   :  { %v611_v6 = vrot.slane %v603_v2, %v592_v49  ;;  %v618_v7 = vrot.slane %v604_v3, %v592_v49  ;;  %v3139_v8 = vrot.slane %v601_v0, %v592_v49  ;;  %v3141_v9 = vrot.slane %v602_v1, %v592_v49 }
 0x1ff   :  { %v3153_v16 = vcombine.high %v3135_v4, %v3135_v4  ;;  %v3163_v20 = vcombine.high %v3137_v5, %v3137_v5 }
 0x200   :  { %v619_v12 = vcombine.high %v611_v6, %v611_v6  ;;  %v620_v13 = vcombine.high %v618_v7, %v618_v7  ;;  %v3155_v18 = vrot.slane %v618_v7, %v592_v49  ;;  %v3159_v19 = vcombine.high %v3139_v8, %v3139_v8 }
 0x201   :  { %v3165_v21 = vrot.slane %v611_v6, %v592_v49  ;;  %v3169_v22 = vcombine.high %v3141_v9, %v3141_v9 }
 0x202   :  { %v3171_v23 = vrot.slane %v620_v13, %v592_v49  ;;  %v826_v25 = vsel %vm3143_vm8, %v3155_v18, %v3139_v8  ;;  %v3179_v26 = vcombine.high %v3155_v18, %v3155_v18  ;;  %v3181_v29 = vrot.slane %v619_v12, %v592_v49 }
 0x203   :  { %v1097_v30 = vsel %vm3143_vm8, %v3165_v21, %v3141_v9  ;;  %v3189_v32 = vcombine.high %v3165_v21, %v3165_v21  ;;  %v1212_v33 = vsel %vm3143_vm8, %v3141_v9, %v3165_v21  ;;  %v1442_v35 = vsel %vm3143_vm8, %v3139_v8, %v3155_v18 }
 0x204   :  { %v689_v36 = vsel %vm3143_vm8, %v3171_v23, %v3135_v4  ;;  %v3205_v37 = vcombine.high %v3171_v23, %v3171_v23  ;;  %v827_v39 = vsel %vm3147_vm9, %v3179_v26, %v3159_v19  ;;  %v962_v43 = vsel %vm3143_vm8, %v3181_v29, %v3137_v5 }
 0x205   :  { %v773_v44 = vadd.f32 %v3095_v14, %v689_v36  ;;  %v3218_v45 = vcombine.high %v3181_v29, %v3181_v29  ;;  %v1098_v46 = vsel %vm3147_vm9, %v3189_v32, %v3169_v22  ;;  %v1213_v47 = vsel %vm3147_vm9, %v3169_v22, %v3189_v32 }
 0x206   :  { %v690_v48 = vsel %vm3147_vm9, %v3205_v37, %v3153_v16  ;;  %v1327_v14 = vsel %vm3143_vm8, %v3137_v5, %v3181_v29  ;;  %v1443_v49 = vsel %vm3147_vm9, %v3159_v19, %v3179_v26  ;;  %v1557_v50 = vsel %vm3143_vm8, %v3135_v4, %v3171_v23 }
 0x207   :  { %2397 = vtanh.f32 %v773_v44  ;;  %v774_v51 = vadd.f32 %v3097_v15, %v690_v48  ;;  %v963_v52 = vsel %vm3147_vm9, %v3218_v45, %v3163_v20  ;;  %v1328_v53 = vsel %vm3147_vm9, %v3163_v20, %v3218_v45 }
 0x208   :  { %v1558_v54 = vsel %vm3147_vm9, %v3153_v16, %v3205_v37  ;;  %v1994_v15 = vmul.f32 -1.442695, %v773_v44 }
 0x209   :  { %v1995_v1 = vmul.f32 -1.442695, %v774_v51 }
 0x20a   :  { %2399 = vpow2.f32 %v1994_v15 }
 0x211   :  { %v2398_v55 = vpop.eup %2397 }
 0x212   :  { %790 = vrot.lane.b32.xlu0 %v2398_v55, %s2519_s4 }
 0x214   :  { %v2400_v56 = vpop.eup %2399 }
 0x215   :  { %v778_v57 = vadd.f32 1.0, %v2400_v56 }
 0x217   :  { %2401 = vrcp.f32 %v778_v57 }
 0x221   :  { %v2402_v58 = vpop.eup %2401 }
 0x222   :  { %v788_v61 = vmul.f32 0.0, %v2402_v58 }
 0x284   :  { %v791_v59 = vpop.permute.xlu0 %790 }
 0x285   :  { %v793_v60 = vmul.f32 %v2402_v58, %v791_v59 }
 0x287   :  { %795 = vrot.lane.b32.xlu0 %v793_v60, %s2520_s30 }
 0x2f9   :  { %v796_v62 = vpop.permute.xlu0 %795 }
 0x2fa   :  { %v798_v63 = vadd.f32 %v796_v62, %v788_v61 }
 0x2fc   :  { %2403 = vtanh.f32 %v798_v63 }
 0x2fd   :  { %2405 = vpow2.f32 %v1995_v1 }
 0x306   :  { %v2404_v0 = vpop.eup %2403 }
 0x307   :  { %801 = vrot.lane.b32.xlu1 %v2404_v0, %s2521_s7  ;;  %v2406_v2 = vpop.eup %2405 }
 0x308   :  { %v785_v3 = vadd.f32 1.0, %v2406_v2 }
 0x30a   :  { %2407 = vrcp.f32 %v785_v3 }
 0x314   :  { %v2408_v6 = vpop.eup %2407 }
 0x379   :  { %v802_v7 = vpop.permute.xlu1 %801 }
 0x37a   :  { %v804_v12 = vmul.f32 %v2402_v58, %v802_v7  ;;  %v805_v13 = vmul.f32 %v2408_v6, %v802_v7 }
 0x37c   :  { %830 = vrot.lane.b32.xlu1 %v804_v12, %s2522_s8  ;;  %832 = vrot.lane.b32.xlu0 %v805_v13, %s2522_s8 }
 0x3ee   :  { %v831_v36 = vpop.permute.xlu1 %830  ;;  %v833_v44 = vpop.permute.xlu0 %832 }
 0x3ef   :  { %v3263_v48 = vsel %vm834_vm10, %v831_v36, %v833_v44 }
 0x3f0   :  { %1998 = vmatmul.mubr.msk.f32.vlgmr.msra.gmra.mrb[12].mxu0 %vm691_vm11, %v3263_v48 }
 0x3f1   :  { %2346 = vmatpush1.bf16.msra.mxu0 %v3034_v34  ;;  %1172 = vmatprep.mubr.f32.mxu0 %v2517_v28 }
 0x3f2   :  { %2348 = vmatprep.subr.bf16.mxu0 %v3046_v38 }
 0x3f5   :  { %2350 = vmatpush1.bf16.msra.mxu0 %v3053_v40 }
 0x3f6   :  { %2006 = vmatprep.subr.msk.mxu0 %vm695_vm0, %v3059_v41 }
 0x3f9   :  { %2007 = vmatpush1.msk.msra.mxu0 %vm695_vm0, %v3067_v42 }
 0x3fa   :  { %2360 = vmatprep.subr.bf16.mxu0 %v3026_v31 }
 0x4c3   :  { %v904_v51 = vpop.f32.mrb[12].mxu0 }
 0x4c4   :  { %v909_v55 = vadd.f32 %v904_v51, %v826_v25  ;;  %v906_v15 = vpop.f32.mrb[13].mxu0 }
 0x4c5   :  { %v910_v56 = vadd.f32 %v906_v15, %v827_v39 }
 0x4c6   :  { %2409 = vtanh.f32 %v909_v55  ;;  %v1999_v58 = vmul.f32 -1.442695, %v909_v55 }
 0x4c7   :  { %v2000_v39 = vmul.f32 -1.442695, %v910_v56 }
 0x4c8   :  { %2411 = vpow2.f32 %v1999_v58 }
 0x4d0   :  { %v2410_v57 = vpop.eup %2409 }
 0x4d1   :  { %926 = vrot.lane.b32.xlu1 %v2410_v57, %s2519_s4 }
 0x4d2   :  { %v2412_v59 = vpop.eup %2411 }
 0x4d3   :  { %v914_v60 = vadd.f32 1.0, %v2412_v59 }
 0x4d5   :  { %2413 = vrcp.f32 %v914_v60 }
 0x4df   :  { %v2414_v61 = vpop.eup %2413 }
 0x4e0   :  { %v924_v25 = vmul.f32 %v2414_v61, %v798_v63 }
 0x543   :  { %v927_v62 = vpop.permute.xlu1 %926 }
 0x544   :  { %v929_v0 = vmul.f32 %v2414_v61, %v927_v62 }
 0x546   :  { %931 = vrot.lane.b32.xlu0 %v929_v0, %s2520_s30 }
 0x5b8   :  { %v932_v1 = vpop.permute.xlu0 %931 }
 0x5b9   :  { %v934_v2 = vadd.f32 %v932_v1, %v924_v25 }
 0x5bb   :  { %2415 = vtanh.f32 %v934_v2 }
 0x5bc   :  { %2417 = vpow2.f32 %v2000_v39 }
 0x5c5   :  { %v2416_v3 = vpop.eup %2415 }
 0x5c6   :  { %937 = vrot.lane.b32.xlu1 %v2416_v3, %s2521_s7  ;;  %v2418_v6 = vpop.eup %2417 }
 0x5c7   :  { %v921_v7 = vadd.f32 1.0, %v2418_v6 }
 0x5c9   :  { %2419 = vrcp.f32 %v921_v7 }
 0x5d3   :  { %v2420_v12 = vpop.eup %2419 }
 0x638   :  { %v938_v13 = vpop.permute.xlu1 %937 }
 0x639   :  { %v940_v36 = vmul.f32 %v2414_v61, %v938_v13  ;;  %v941_v44 = vmul.f32 %v2420_v12, %v938_v13 }
 0x63b   :  { %966 = vrot.lane.b32.xlu0 %v940_v36, %s2522_s8  ;;  %968 = vrot.lane.b32.xlu1 %v941_v44, %s2522_s8 }
 0x6ad   :  { %v967_v63 = vpop.permute.xlu0 %966  ;;  %v969_v51 = vpop.permute.xlu1 %968 }
 0x6ae   :  { %v3292_v55 = vsel %vm834_vm10, %v967_v63, %v969_v51 }
 0x6af   :  { %2003 = vmatmul.mubr.msk.f32.vlgmr.msra.gmra.mrb[10].mxu1 %vm691_vm11, %v3292_v55 }
 0x6b0   :  { %2354 = vmatpush1.bf16.msra.mxu1 %v3034_v34  ;;  %1287 = vmatprep.mubr.f32.mxu1 %v2517_v28 }
 0x6b1   :  { %2356 = vmatprep.subr.bf16.mxu1 %v3046_v38 }
 0x6b4   :  { %2358 = vmatpush1.bf16.msra.mxu1 %v3053_v40 }
 0x6b5   :  { %2011 = vmatprep.subr.msk.mxu1 %vm695_vm0, %v3059_v41 }
 0x6b8   :  { %2012 = vmatpush1.msk.msra.mxu1 %vm695_vm0, %v3067_v42 }
 0x6b9   :  { %2368 = vmatprep.subr.bf16.mxu1 %v3026_v31 }
 0x782   :  { %v1039_v15 = vpop.f32.mrb[10].mxu1 }
 0x783   :  { %v1044_v56 = vadd.f32 %v1039_v15, %v962_v43  ;;  %v1041_v57 = vpop.f32.mrb[11].mxu1 }
 0x784   :  { %v1045_v58 = vadd.f32 %v1041_v57, %v963_v52 }
 0x785   :  { %2421 = vtanh.f32 %v1044_v56  ;;  %v2004_v60 = vmul.f32 -1.442695, %v1044_v56 }
 0x786   :  { %v2005_v52 = vmul.f32 -1.442695, %v1045_v58 }
 0x787   :  { %2423 = vpow2.f32 %v2004_v60 }
 0x78f   :  { %v2422_v59 = vpop.eup %2421 }
 0x790   :  { %1061 = vrot.lane.b32.xlu0 %v2422_v59, %s2519_s4 }
 0x791   :  { %v2424_v61 = vpop.eup %2423 }
 0x792   :  { %v1049_v62 = vadd.f32 1.0, %v2424_v61 }
 0x794   :  { %2425 = vrcp.f32 %v1049_v62 }
 0x79e   :  { %v2426_v0 = vpop.eup %2425 }
 0x79f   :  { %v1059_v43 = vmul.f32 %v2426_v0, %v934_v2 }
 0x802   :  { %v1062_v25 = vpop.permute.xlu0 %1061 }
 0x803   :  { %v1064_v1 = vmul.f32 %v2426_v0, %v1062_v25 }
 0x805   :  { %1066 = vrot.lane.b32.xlu1 %v1064_v1, %s2520_s30 }
 0x877   :  { %v1067_v3 = vpop.permute.xlu1 %1066 }
 0x878   :  { %v1069_v39 = vadd.f32 %v1067_v3, %v1059_v43 }
 0x87a   :  { %2427 = vtanh.f32 %v1069_v39 }
 0x87b   :  { %2429 = vpow2.f32 %v2005_v52 }
 0x884   :  { %v2428_v6 = vpop.eup %2427 }
 0x885   :  { %1072 = vrot.lane.b32.xlu0 %v2428_v6, %s2521_s7  ;;  %v2430_v7 = vpop.eup %2429 }
 0x886   :  { %v1056_v12 = vadd.f32 1.0, %v2430_v7 }
 0x888   :  { %2431 = vrcp.f32 %v1056_v12 }
 0x892   :  { %v2432_v13 = vpop.eup %2431 }
 0x8f7   :  { %v1073_v36 = vpop.permute.xlu0 %1072 }
 0x8f8   :  { %v1075_v44 = vmul.f32 %v2426_v0, %v1073_v36  ;;  %v1076_v63 = vmul.f32 %v2432_v13, %v1073_v36 }
 0x8fa   :  { %1101 = vrot.lane.b32.xlu1 %v1075_v44, %s2522_s8  ;;  %1103 = vrot.lane.b32.xlu0 %v1076_v63, %s2522_s8 }
 0x96c   :  { %v1102_v2 = vpop.permute.xlu1 %1101  ;;  %v1104_v51 = vpop.permute.xlu0 %1103 }
 0x96d   :  { %v3321_v15 = vsel %vm834_vm10, %v1102_v2, %v1104_v51 }
 0x96e   :  { %2008 = vmatmul.mubr.msk.f32.vlgmr.msra.gmra.mrb[14].mxu0 %vm691_vm11, %v3321_v15 }
 0x96f   :  { %2362 = vmatpush1.bf16.msra.mxu0 %v3034_v34  ;;  %1402 = vmatprep.mubr.f32.mxu0 %v2517_v28 }
 0x970   :  { %2364 = vmatprep.subr.bf16.mxu0 %v3046_v38 }
 0x973   :  { %2366 = vmatpush1.bf16.msra.mxu0 %v3053_v40 }
 0x974   :  { %2016 = vmatprep.subr.msk.mxu0 %vm695_vm0, %v3059_v41 }
 0x977   :  { %2017 = vmatpush1.msk.msra.mxu0 %vm695_vm0, %v3067_v42 }
 0x978   :  { %2376 = vmatprep.subr.bf16.mxu0 %v3026_v31 }
 0xa41   :  { %v1174_v56 = vpop.f32.mrb[14].mxu0 }
 0xa42   :  { %v1179_v57 = vadd.f32 %v1174_v56, %v1097_v30  ;;  %v1176_v58 = vpop.f32.mrb[15].mxu0 }
 0xa43   :  { %v1180_v59 = vadd.f32 %v1176_v58, %v1098_v46 }
 0xa44   :  { %2433 = vtanh.f32 %v1179_v57  ;;  %v2009_v61 = vmul.f32 -1.442695, %v1179_v57 }
 0xa45   :  { %v2010_v46 = vmul.f32 -1.442695, %v1180_v59 }
 0xa46   :  { %2435 = vpow2.f32 %v2009_v61 }
 0xa4e   :  { %v2434_v60 = vpop.eup %2433 }
 0xa4f   :  { %1196 = vrot.lane.b32.xlu1 %v2434_v60, %s2519_s4 }
 0xa50   :  { %v2436_v31 = vpop.eup %2435 }
 0xa51   :  { %v1184_v62 = vadd.f32 1.0, %v2436_v31 }
 0xa53   :  { %2437 = vrcp.f32 %v1184_v62 }
 0xa5d   :  { %v2438_v0 = vpop.eup %2437 }
 0xa5e   :  { %v1194_v30 = vmul.f32 %v2438_v0, %v1069_v39 }
 0xac1   :  { %v1197_v25 = vpop.permute.xlu1 %1196 }
 0xac2   :  { %v1199_v1 = vmul.f32 %v2438_v0, %v1197_v25 }
 0xac4   :  { %1201 = vrot.lane.b32.xlu0 %v1199_v1, %s2520_s30 }
 0xb36   :  { %v1202_v43 = vpop.permute.xlu0 %1201 }
 0xb37   :  { %v1204_v3 = vadd.f32 %v1202_v43, %v1194_v30 }
 0xb39   :  { %2439 = vtanh.f32 %v1204_v3 }
 0xb3a   :  { %2441 = vpow2.f32 %v2010_v46 }
 0xb43   :  { %v2440_v6 = vpop.eup %2439 }
 0xb44   :  { %1207 = vrot.lane.b32.xlu1 %v2440_v6, %s2521_s7  ;;  %v2442_v52 = vpop.eup %2441 }
 0xb45   :  { %v1191_v7 = vadd.f32 1.0, %v2442_v52 }
 0xb47   :  { %2443 = vrcp.f32 %v1191_v7 }
 0xb51   :  { %v2444_v12 = vpop.eup %2443 }
 0xbb6   :  { %v1208_v13 = vpop.permute.xlu1 %1207 }
 0xbb7   :  { %v1210_v36 = vmul.f32 %v2438_v0, %v1208_v13  ;;  %v1211_v44 = vmul.f32 %v2444_v12, %v1208_v13 }
 0xbb9   :  { %1216 = vrot.lane.b32.xlu0 %v1210_v36, %s2522_s8  ;;  %1218 = vrot.lane.b32.xlu1 %v1211_v44, %s2522_s8 }
 0xc2b   :  { %v1217_v39 = vpop.permute.xlu0 %1216  ;;  %v1219_v63 = vpop.permute.xlu1 %1218 }
 0xc2c   :  { %v3350_v2 = vsel %vm834_vm10, %v1217_v39, %v1219_v63 }
 0xc2d   :  { %2013 = vmatmul.mubr.msk.f32.vlgmr.msra.gmra.mrb[12].mxu1 %vm691_vm11, %v3350_v2 }
 0xc2e   :  { %2370 = vmatpush1.bf16.msra.mxu1 %v3034_v34  ;;  %1517 = vmatprep.mubr.f32.mxu1 %v2517_v28 }
 0xc2f   :  { %2372 = vmatprep.subr.bf16.mxu1 %v3046_v38 }
 0xc32   :  { %2374 = vmatpush1.bf16.msra.mxu1 %v3053_v40 }
 0xc33   :  { %2021 = vmatprep.subr.msk.mxu1 %vm695_vm0, %v3059_v41 }
 0xc36   :  { %2022 = vmatpush1.msk.msra.mxu1 %vm695_vm0, %v3067_v42 }
 0xd00   :  { %v1289_v51 = vpop.f32.mrb[12].mxu1 }
 0xd01   :  { %v1294_v56 = vadd.f32 %v1289_v51, %v1212_v33  ;;  %v1291_v57 = vpop.f32.mrb[13].mxu1 }
 0xd02   :  { %v1295_v58 = vadd.f32 %v1291_v57, %v1213_v47 }
 0xd03   :  { %2445 = vtanh.f32 %v1294_v56  ;;  %v2014_v60 = vmul.f32 -1.442695, %v1294_v56 }
 0xd04   :  { %v2015_v32 = vmul.f32 -1.442695, %v1295_v58 }
 0xd05   :  { %2447 = vpow2.f32 %v2014_v60 }
 0xd0d   :  { %v2446_v59 = vpop.eup %2445 }
 0xd0e   :  { %1311 = vrot.lane.b32.xlu0 %v2446_v59, %s2519_s4 }
 0xd0f   :  { %v2448_v61 = vpop.eup %2447 }
 0xd10   :  { %v1299_v31 = vadd.f32 1.0, %v2448_v61 }
 0xd12   :  { %2449 = vrcp.f32 %v1299_v31 }
 0xd1c   :  { %v2450_v62 = vpop.eup %2449 }
 0xd1d   :  { %v1309_v21 = vmul.f32 %v2450_v62, %v1204_v3 }
 0xd80   :  { %v1312_v0 = vpop.permute.xlu0 %1311 }
 0xd81   :  { %v1314_v9 = vmul.f32 %v2450_v62, %v1312_v0 }
 0xd83   :  { %1316 = vrot.lane.b32.xlu1 %v1314_v9, %s2520_s30 }
 0xdf5   :  { %v1317_v33 = vpop.permute.xlu1 %1316 }
 0xdf6   :  { %v1319_v25 = vadd.f32 %v1317_v33, %v1309_v21 }
 0xdf8   :  { %2451 = vtanh.f32 %v1319_v25 }
 0xdf9   :  { %2453 = vpow2.f32 %v2015_v32 }
 0xe02   :  { %v2452_v22 = vpop.eup %2451 }
 0xe03   :  { %1322 = vrot.lane.b32.xlu0 %v2452_v22, %s2521_s7  ;;  %v2454_v47 = vpop.eup %2453 }
 0xe04   :  { %v1306_v1 = vadd.f32 1.0, %v2454_v47 }
 0xe06   :  { %2455 = vrcp.f32 %v1306_v1 }
 0xe10   :  { %v2456_v30 = vpop.eup %2455 }
 0xe75   :  { %v1323_v43 = vpop.permute.xlu0 %1322 }
 0xe76   :  { %v1325_v6 = vmul.f32 %v2450_v62, %v1323_v43  ;;  %v1326_v46 = vmul.f32 %v2456_v30, %v1323_v43 }
 0xe78   :  { %1331 = vrot.lane.b32.xlu1 %v1325_v6, %s2522_s8  ;;  %1333 = vrot.lane.b32.xlu0 %v1326_v46, %s2522_s8 }
 0xeea   :  { %v1332_v3 = vpop.permute.xlu1 %1331  ;;  %v1334_v52 = vpop.permute.xlu0 %1333 }
 0xeeb   :  { %v3378_v7 = vsel %vm834_vm10, %v1332_v3, %v1334_v52 }
 0xeec   :  { %2018 = vmatmul.mubr.msk.f32.vlgmr.msra.gmra.mrb[16].mxu0 %vm691_vm11, %v3378_v7 }
 0xeed   :  { %2378 = vmatpush1.bf16.msra.mxu0 %v3034_v34  ;;  %1632 = vmatprep.mubr.f32.mxu0 %v2517_v28 }
 0xeee   :  { %2380 = vmatprep.subr.bf16.mxu0 %v3046_v38 }
 0xef1   :  { %2382 = vmatpush1.bf16.msra.mxu0 %v3053_v40 }
 0xef2   :  { %2026 = vmatprep.subr.msk.mxu0 %vm695_vm0, %v3059_v41 }
 0xef5   :  { %2027 = vmatpush1.msk.msra.mxu0 %vm695_vm0, %v3067_v42 }
 0xfbf   :  { %v1404_v12 = vpop.f32.mrb[16].mxu0 }
 0xfc0   :  { %v1409_v13 = vadd.f32 %v1404_v12, %v1327_v14  ;;  %v1406_v34 = vpop.f32.mrb[17].mxu0 }
 0xfc1   :  { %v1410_v28 = vadd.f32 %v1406_v34, %v1328_v53 }
 0xfc2   :  { %2457 = vtanh.f32 %v1409_v13  ;;  %v2019_v40 = vmul.f32 -1.442695, %v1409_v13 }
 0xfc3   :  { %v2020_v45 = vmul.f32 -1.442695, %v1410_v28 }
 0xfc4   :  { %2459 = vpow2.f32 %v2019_v40 }
 0xfcc   :  { %v2458_v38 = vpop.eup %2457 }
 0xfcd   :  { %1426 = vrot.lane.b32.xlu1 %v2458_v38, %s2519_s4 }
 0xfce   :  { %v2460_v41 = vpop.eup %2459 }
 0xfcf   :  { %v1414_v42 = vadd.f32 1.0, %v2460_v41 }
 0xfd1   :  { %2461 = vrcp.f32 %v1414_v42 }
 0xfdb   :  { %v2462_v36 = vpop.eup %2461 }
 0xfdc   :  { %v1424_v29 = vmul.f32 %v2462_v36, %v1319_v25 }
0x103f   :  { %v1427_v44 = vpop.permute.xlu1 %1426 }
0x1040   :  { %v1429_v5 = vmul.f32 %v2462_v36, %v1427_v44 }
0x1042   :  { %1431 = vrot.lane.b32.xlu0 %v1429_v5, %s2520_s30 }
0x10b4   :  { %v1432_v14 = vpop.permute.xlu0 %1431 }
0x10b5   :  { %v1434_v39 = vadd.f32 %v1432_v14, %v1424_v29 }
0x10b7   :  { %2463 = vtanh.f32 %v1434_v39 }
0x10b8   :  { %2465 = vpow2.f32 %v2020_v45 }
0x10c1   :  { %v2464_v20 = vpop.eup %2463 }
0x10c2   :  { %1437 = vrot.lane.b32.xlu1 %v2464_v20, %s2521_s7  ;;  %v2466_v53 = vpop.eup %2465 }
0x10c3   :  { %v1421_v63 = vadd.f32 1.0, %v2466_v53  ;;  %v2523_v53 = vmov 1966171168  }
0x10c5   :  { %2467 = vrcp.f32 %v1421_v63  ;;  %v1697_v63 = vunpack.c.l.s4 %v2523_v53 }
0x10cf   :  { %v2468_v51 = vpop.eup %2467 }
0x1134   :  { %v1438_v56 = vpop.permute.xlu1 %1437 }
0x1135   :  { %v1440_v57 = vmul.f32 %v2462_v36, %v1438_v56  ;;  %v1441_v58 = vmul.f32 %v2468_v51, %v1438_v56  ;;  %v1698_v51 = vunpack.c.0.s8 %v1697_v63 }
0x1137   :  { %1446 = vrot.lane.b32.xlu0 %v1440_v57, %s2522_s8  ;;  %1448 = vrot.lane.b32.xlu1 %v1441_v58, %s2522_s8  ;;  %v3444_v56 = vsub.s32 %v1698_v51, %v3110_v24  ;;  %v1690_v57 = vsel %vm668_vm12, %v3350_v2, %v3378_v7  ;;  %v1691_v58 = vsel %vm668_vm12, %v3378_v7, %v3350_v2 }
0x11a9   :  { %v1447_v59 = vpop.permute.xlu0 %1446  ;;  %v1449_v60 = vpop.permute.xlu1 %1448 }
0x11aa   :  { %v3406_v61 = vsel %vm834_vm10, %v1447_v59, %v1449_v60  ;;  %v1773_v59 = vrot.slane %v1690_v57, %v3444_v56  ;;  %v1796_v60 = vrot.slane %v1691_v58, %v3444_v56 }
0x11ab   :  { %2023 = vmatmul.mubr.msk.f32.vlgmr.msra.gmra.mrb[14].mxu1 %vm691_vm11, %v3406_v61  ;;  %v1687_v24 = vsel %vm668_vm12, %v3321_v15, %v3406_v61  ;;  %v1692_v2 = vsel %vm668_vm12, %v3406_v61, %v3321_v15 }
0x11ac   :  { %v1750_v7 = vrot.slane %v1687_v24, %v3444_v56 }
0x127e   :  { %v1519_v31 = vpop.f32.mrb[14].mxu1 }
0x127f   :  { %v1524_v62 = vadd.f32 %v1519_v31, %v1442_v35  ;;  %v1521_v0 = vpop.f32.mrb[15].mxu1 }
0x1280   :  { %v1525_v9 = vadd.f32 %v1521_v0, %v1443_v49  ;;  %v1797_v0 = vcombine.high %v1796_v60, %v1796_v60 }
0x1281   :  { %2469 = vtanh.f32 %v1524_v62  ;;  %v2024_v33 = vmul.f32 -1.442695, %v1524_v62  ;;  %v1774_v62 = vcombine.high %v1773_v59, %v1773_v59 }
0x1282   :  { %v2025_v26 = vmul.f32 -1.442695, %v1525_v9 }
0x1283   :  { %2471 = vpow2.f32 %v2024_v33  ;;  %v1819_v33 = vrot.slane %v1692_v2, %v3444_v56 }
0x128b   :  { %v2470_v21 = vpop.eup %2469 }
0x128c   :  { %1541 = vrot.lane.b32.xlu0 %v2470_v21, %s2519_s4  ;;  %v1781_v21 = vrot.slane %v1773_v59, %v3444_v56 }
0x128d   :  { %v2472_v25 = vpop.eup %2471 }
0x128e   :  { %v1529_v22 = vadd.f32 1.0, %v2472_v25  ;;  %v1788_v25 = vrot.slane %v1774_v62, %v3444_v56  ;;  %v1904_v61 = vrot.slane %v1781_v21, %v3114_v27 }
0x1290   :  { %2473 = vrcp.f32 %v1529_v22  ;;  %v1804_v22 = vrot.slane %v1796_v60, %v3444_v56 }
0x129a   :  { %v2474_v32 = vpop.eup %2473 }
0x129b   :  { %v1539_v18 = vmul.f32 %v2474_v32, %v1434_v39 }
0x12fe   :  { %v1542_v47 = vpop.permute.xlu0 %1541 }
0x12ff   :  { %v1544_v8 = vmul.f32 %v2474_v32, %v1542_v47 }
0x1301   :  { %1546 = vrot.lane.b32.xlu1 %v1544_v8, %s2520_s30  ;;  %v1751_v8 = vcombine.high %v1750_v7, %v1750_v7 }
0x1373   :  { %v1547_v35 = vpop.permute.xlu1 %1546 }
0x1374   :  { %v1549_v1 = vadd.f32 %v1547_v35, %v1539_v18  ;;  %v1820_v18 = vcombine.high %v1819_v33, %v1819_v33 }
0x1376   :  { %2475 = vtanh.f32 %v1549_v1 }
0x1377   :  { %2477 = vpow2.f32 %v2025_v26 }
0x1380   :  { %v2476_v19 = vpop.eup %2475 }
0x1381   :  { %1552 = vrot.lane.b32.xlu0 %v2476_v19, %s2521_s7  ;;  %v2478_v49 = vpop.eup %2477 }
0x1382   :  { %v1536_v30 = vadd.f32 1.0, %v2478_v49  ;;  %v1908_v49 = vrot.slane %v1788_v25, %v3114_v27 }
0x1384   :  { %2479 = vrcp.f32 %v1536_v30  ;;  %v1914_v30 = vrot.slane %v1804_v22, %v3114_v27 }
0x138e   :  { %v2480_v43 = vpop.eup %2479 }
0x13f3   :  { %v1553_v6 = vpop.permute.xlu0 %1552 }
0x13f4   :  { %v1555_v46 = vmul.f32 %v2474_v32, %v1553_v6  ;;  %v1556_v3 = vmul.f32 %v2480_v43, %v1553_v6  ;;  %v1811_v32 = vrot.slane %v1797_v0, %v3444_v56 }
0x13f6   :  { %1561 = vrot.lane.b32.xlu1 %v1555_v46, %s2522_s8  ;;  %1563 = vrot.lane.b32.xlu0 %v1556_v3, %s2522_s8  ;;  %v1918_v43 = vrot.slane %v1811_v32, %v3114_v27  ;;  %v1827_v46 = vrot.slane %v1819_v33, %v3444_v56 }
0x1468   :  { %v1562_v52 = vpop.permute.xlu1 %1561  ;;  %v1564_v12 = vpop.permute.xlu0 %1563 }
0x1469   :  { %v1565_v13 = vsel %vm834_vm10, %v1562_v52, %v1564_v12  ;;  %v1765_v12 = vrot.slane %v1751_v8, %v3444_v56 }
0x146a   :  { %2028 = vmatmul.mubr.msk.f32.vlgmr.msra.gmra.mrb[18].mxu0 %vm691_vm11, %v1565_v13  ;;  %v1684_v31 = vsel %vm668_vm12, %v3292_v55, %v1565_v13  ;;  %v1693_v47 = vsel %vm668_vm12, %v1565_v13, %v3292_v55  ;;  %v1758_v55 = vrot.slane %v1750_v7, %v3444_v56 }
0x146b   :  { %v1727_v9 = vrot.slane %v1684_v31, %v3444_v56 }
0x146d   :  { %v1728_v15 = vcombine.high %v1727_v9, %v1727_v9  ;;  %v1735_v35 = vrot.slane %v1727_v9, %v3444_v56 }
0x146f   :  { %v1742_v13 = vrot.slane %v1728_v15, %v3444_v56 }
0x153d   :  { %v1634_v34 = vpop.f32.mrb[18].mxu0 }
0x153e   :  { %v1639_v28 = vadd.f32 %v1634_v34, %v1557_v50  ;;  %v1636_v38 = vpop.f32.mrb[19].mxu0 }
0x153f   :  { %v1640_v40 = vadd.f32 %v1636_v38, %v1558_v54  ;;  %v1834_v38 = vrot.slane %v1820_v18, %v3444_v56 }
0x1540   :  { %2481 = vtanh.f32 %v1639_v28  ;;  %v2029_v42 = vmul.f32 -1.442695, %v1639_v28 }
0x1541   :  { %v2030_v37 = vmul.f32 -1.442695, %v1640_v40  ;;  %v1928_v53 = vrot.slane %v1834_v38, %v3114_v27 }
0x1542   :  { %2483 = vpow2.f32 %v2029_v42 }
0x154a   :  { %v2482_v41 = vpop.eup %2481 }
0x154b   :  { %1656 = vrot.lane.b32.xlu1 %v2482_v41, %s2519_s4  ;;  %v1884_v41 = vrot.slane %v1735_v35, %v3114_v27 }
0x154c   :  { %v2484_v36 = vpop.eup %2483 }
0x154d   :  { %v1644_v44 = vadd.f32 1.0, %v2484_v36 }
0x154f   :  { %2485 = vrcp.f32 %v1644_v44  ;;  %v1924_v44 = vrot.slane %v1827_v46, %v3114_v27 }
0x1559   :  { %v2486_v10 = vpop.eup %2485 }
0x155a   :  { %v1654_v23 = vmul.f32 %v2486_v10, %v1549_v1  ;;  %v1842_v1 = vrot.slane %v1693_v47, %v3444_v56 }
0x155c   :  { %v1843_v40 = vcombine.high %v1842_v1, %v1842_v1 }
0x15bd   :  { %v1657_v5 = vpop.permute.xlu1 %1656 }
0x15be   :  { %v1659_v4 = vmul.f32 %v2486_v10, %v1657_v5  ;;  %v1888_v5 = vrot.slane %v1742_v13, %v3114_v27 }
0x15c0   :  { %1661 = vrot.lane.b32.xlu0 %v1659_v4, %s2520_s30 }
0x1632   :  { %v1662_v11 = vpop.permute.xlu0 %1661 }
0x1633   :  { %v1664_v50 = vadd.f32 %v1662_v11, %v1654_v23 }
0x1635   :  { %2487 = vtanh.f32 %v1664_v50  ;;  %v1898_v50 = vrot.slane %v1765_v12, %v3114_v27 }
0x1636   :  { %2489 = vpow2.f32 %v2030_v37 }
0x163f   :  { %v2488_v16 = vpop.eup %2487 }
0x1640   :  { %1667 = vrot.lane.b32.xlu1 %v2488_v16, %s2521_s7  ;;  %v2490_v54 = vpop.eup %2489  ;;  %v1857_v16 = vrot.slane %v1843_v40, %v3444_v56 }
0x1641   :  { %v1651_v29 = vadd.f32 1.0, %v2490_v54 }
0x1642   :  { %v1938_v57 = vrot.slane %v1857_v16, %v3114_v27 }
0x1643   :  { %2491 = vrcp.f32 %v1651_v29 }
0x164d   :  { %v2492_v14 = vpop.eup %2491 }
0x16b2   :  { %v1668_v39 = vpop.permute.xlu1 %1667 }
0x16b3   :  { %v1670_v20 = vmul.f32 %v2486_v10, %v1668_v39  ;;  %v1671_v45 = vmul.f32 %v2492_v14, %v1668_v39  ;;  %v1850_v10 = vrot.slane %v1842_v1, %v3444_v56 }
0x16b5   :  { %1675 = vrot.lane.b32.xlu0 %v1670_v20, %s2522_s8  ;;  %1677 = vrot.lane.b32.xlu1 %v1671_v45, %s2522_s8  ;;  %v1934_v39 = vrot.slane %v1850_v10, %v3114_v27 }
0x1727   :  { %v1676_v19 = vpop.permute.xlu0 %1675  ;;  %v1678_v26 = vpop.permute.xlu1 %1677 }
0x1728   :  { %v1679_v6 = vsel %vm834_vm10, %v1676_v19, %v1678_v26 }
0x1729   :  { %v1681_v3 = vsel %vm668_vm12, %v3263_v48, %v1679_v6  ;;  %v1694_v52 = vsel %vm668_vm12, %v1679_v6, %v3263_v48  ;;  %v1894_v48 = vrot.slane %v1758_v55, %v3114_v27 }
0x172a   :  { %v1702_v34 = vrot.slane %v1681_v3, %v3444_v56  ;;  %v1865_v28 = vrot.slane %v1694_v52, %v3444_v56 }
0x172c   :  { %v1703_v42 = vcombine.high %v1702_v34, %v1702_v34  ;;  %v1710_v36 = vrot.slane %v1702_v34, %v3444_v56  ;;  %v1866_v17 = vcombine.high %v1865_v28, %v1865_v28  ;;  %v1873_v23 = vrot.slane %v1865_v28, %v3444_v56 }
0x172e   :  { %v1717_v4 = vrot.slane %v1703_v42, %v3444_v56  ;;  %v1952_v11 = vsel %vm1951_vm13, %v1710_v36, %v1884_v41  ;;  %v1880_v54 = vrot.slane %v1866_v17, %v3444_v56  ;;  %v1944_v63 = vrot.slane %v1873_v23, %v3114_v27 }
0x172f   :  { %v1955_v37 = vsel %vm1954_vm14, %v1952_v11, %v1894_v48 }
0x1730   :  { %v1953_v29 = vsel %vm1951_vm13, %v1717_v4, %v1888_v5  ;;  %v1958_v14 = vsel %vm1957_vm15, %v1955_v37, %v1904_v61  ;;  %v1948_v60 = vrot.slane %v1880_v54, %v3114_v27 }
0x1731   :  { %v1956_v20 = vsel %vm1954_vm14, %v1953_v29, %v1898_v50  ;;  %v1960_v45 = vsel %vm695_vm0, %v1958_v14, %v1914_v30 }
0x1732   :  { %v1959_v51 = vsel %vm1957_vm15, %v1956_v20, %v1908_v49  ;;  %v1963_v56 = vsel %vm1962_vm1, %v1960_v45, %v1924_v44 }
0x1733   :  { %v1961_v58 = vsel %vm695_vm0, %v1959_v51, %v1918_v43  ;;  %v1966_v59 = vsel %vm1965_vm2, %v1963_v56, %v1934_v39 }
0x1734   :  { %v1964_v24 = vsel %vm1962_vm1, %v1961_v58, %v1928_v53  ;;  %v1969_v31 = vsel %vm1968_vm3, %v1966_v59, %v1944_v63 }
0x1735   :  { %v1967_v62 = vsel %vm1965_vm2, %v1964_v24, %v1938_v57  ;;  %1971 = vst.msk [vmem:[#allocation2] sm:$0xff] %vm691_vm11, %v1969_v31 }
0x1736   :  { %v1970_v0 = vsel %vm1968_vm3, %v1967_v62, %v1948_v60 }
0x1737   :  { %1972 = vst.msk [vmem:[#allocation2 + $0x8] sm:$0xff] %vm691_vm11, %v1970_v0 }
0x1738   :  { %2504 = shalt.err (!%p2501_p4)
}
0x1739   :  { %s2505_s14 = scalar_lea.hbm %s3547_s6, 256 }
0x173a   :  { %p2506_p5 = scmp.ne.s32.totalorder %s3547_s6, %s2505_s14  ;;  %p2509_p6 = scmp.lt.u32.totalorder %s2505_s14, %s3547_s6 }
0x173c   :  { %p2511_p7 = pnand %p2509_p6, %p2506_p5 }
0x173e   :  { %2514 = shalt.err (!%p2511_p7)
}
0x173f   :  { %s2525_s17 = smov 128   ;;  %s2526_s18 = smov 8  }
0x1740   :  { %1984 = dma.vmem_to_hbm [thread:$0]  %s1979_s10, 256, %s3547_s6, [#allocation3], %s2525_s17, %s2525_s17, %s2526_s18  }
0x1741   :  { %2515 = dma.done.wait [#allocation3], 256  }
0x1742   :  { %2516 = vsyncadd [#allocation3], 4294967040 }
0x1743   :  { %1988 = vsyncpa [#allocation3], 1 }

</bundles_post_ra>
